<compile_context>
chip_gen: v7x
topology: tpu7x:2x2x1
jax: 0.10.0
libtpu: 0.0.40
codegen_flags: <defaults>
</compile_context>

<pallas_src>
import functools
import math

import jax
import jax.numpy as jnp
import numpy as np
from jax import lax
from jax.experimental import pallas as pl
from jax.experimental.pallas import tpu as pltpu

_HIGHEST = jax.lax.Precision.HIGHEST


def gmt_pool_kernel(batch_ref, xt_ref, qk_ref, gid_ref, hmask_ref,
                    wv_ref, bv_ref, wo_ref, sel_ref, bo_ref,
                    out_ref, m_sc, l_sc, acc_sc):
    """One node tile per grid step; online masked softmax over node tiles."""
    step = pl.program_id(0)

    @pl.when(step == 0)
    def _init():
        m_sc[...] = jnp.full_like(m_sc, -1e30)
        l_sc[...] = jnp.zeros_like(l_sc)
        acc_sc[...] = jnp.zeros_like(acc_sc)

    # Scores for the (query, head)-distinct rows only: a single lane-dense MXU
    # dot contracting over C_in (K projection + bias already folded into qk).
    s_base = jnp.dot(qk_ref[...], xt_ref[...],
                     preferred_element_type=jnp.float32,
                     precision=_HIGHEST)                         # (QHp, TN)

    # Replicate across graphs (scores are graph independent; only the mask
    # differs).  QHp is a multiple of 8, so this is an aligned sublane concat,
    # far cheaper than doing the B-fold redundant MACs.
    reps = gid_ref.shape[0] // s_base.shape[0]
    if reps > 1:
        s = jnp.concatenate([s_base] * reps, axis=0)             # (Rp, TN)
    else:
        s = s_base

    valid = batch_ref[...] == gid_ref[...]       # (1,TN) vs (Rp,1) -> (Rp,TN)
    s = jnp.where(valid, s, -1e30)               # scores stay f32 -> safe sentinel

    # Online (flash-style) masked softmax over the node axis.
    m_prev = m_sc[...]
    m_new = jnp.maximum(m_prev, jnp.max(s, axis=-1, keepdims=True))
    alpha = jnp.exp(m_prev - m_new)
    p = jnp.exp(s - m_new)
    p = jnp.where(valid, p, 0.0)                 # exact zeros for masked lanes
    l_sc[...] = alpha * l_sc[...] + jnp.sum(p, axis=-1, keepdims=True)

    # P @ x, contracting the node (lane) axis of the single feature-major x
    # stream; the small (C_in, TN) rhs reorientation rides the XLU and hides
    # under the x DMA (cheaper than streaming x twice in both layouts).
    pv = lax.dot_general(p.astype(xt_ref.dtype), xt_ref[...],
                         (((1,), (1,)), ((), ())),
                         preferred_element_type=jnp.float32,
                         precision=_HIGHEST)                     # (Rp, C_in)
    acc_sc[...] = alpha * acc_sc[...] + pv
    m_sc[...] = m_new

    # Finalize: everything below is N-independent and runs exactly once.
    @pl.when(step == pl.num_programs(0) - 1)
    def _finalize():
        l = l_sc[...]
        nz = (l > 0.0).astype(jnp.float32)       # 0 only for empty graphs
        inv = jnp.where(l > 0.0, 1.0 / l, 0.0)   # exact reciprocal
        zx = acc_sc[...] * inv                   # (Rp, C_in) = P @ x
        # Value projection folded behind the softmax + per-row head masking.
        z = (jnp.dot(zx, wv_ref[...], preferred_element_type=jnp.float32,
                     precision=_HIGHEST)
             + nz * bv_ref[...]) * hmask_ref[...]                # (Rp, E)
        y = jnp.dot(z, wo_ref[...], preferred_element_type=jnp.float32,
                    precision=_HIGHEST)                          # (Rp, E_out)
        # Sum the H head rows of each (graph, query) with a 0/1 selection
        # matrix (single matmul; avoids an unaligned sublane->lane reshape).
        out = jnp.dot(sel_ref[...], y, preferred_element_type=jnp.float32,
                      precision=_HIGHEST) + bo_ref[...]
        out_ref[...] = out.astype(out_ref.dtype)


def prepare_gmt_params(params, *, num_heads, batch_size):
    """One-time host-side parameter prep (hoisted out of the hot path)."""
    g = {k: np.asarray(v, np.float64) for k, v in params.items()}
    Q, E = g["queries"].shape
    H = num_heads
    d = E // H
    C_in = g["wk"].shape[1]
    E_out = g["wo"].shape[0]
    B = batch_size
    scale = 1.0 / math.sqrt(d)

    # Fused x -> attn-K / attn-V projections, [in, out] layout.  The K bias is
    # dropped: q . bk is constant along the node axis and cancels in softmax.
    wk_f = g["wk"].T @ g["wka"].T                                # (C_in, E)
    wv_f = g["wv"].T @ g["wva"].T                                # (C_in, E)
    bv_f = g["bv"] @ g["wva"].T + g["bva"]                       # (1, E)

    # Projected, head-masked, pre-scaled queries folded through wk_f, one row
    # per (query, head) — NOT broadcast over graphs.
    q2 = g["queries"] @ g["wqa"].T + g["bqa"]                    # (Q, E)
    head_mask = (np.arange(E)[None, :] // d
                 == np.arange(H)[:, None]).astype(np.float64)    # (H, E)
    q_hm = (q2[:, None, :] * head_mask[None, :, :] * scale).reshape(Q * H, E)
    qk = q_hm @ wk_f.T                                           # (Q*H, C_in)

    QH = Q * H
    QHp = ((QH + 7) // 8) * 8          # sublane-aligned row-block per graph
    Rp = B * QHp

    qk_pad = np.zeros((QHp, C_in), np.float64)
    qk_pad[:QH] = qk

    j = np.arange(QHp)
    row_is_real = j < QH
    h_of_j = np.where(row_is_real, j % H, 0)

    # Per-row graph id (padded rows get a sentinel that never matches a node).
    gid = np.repeat(np.arange(B, dtype=np.int32), QHp)
    gid = np.where(np.tile(row_is_real, B), gid, np.int32(-1)).astype(np.int32)

    # Per-row head-column mask for the value / out-projection path.
    hmask_rows = np.tile(head_mask[h_of_j] * row_is_real[:, None], (B, 1))

    # Selection matrix summing the H head rows of each (graph, query).
    sel = np.zeros((B * Q, Rp), np.float32)
    for b in range(B):
        for jj in range(QH):
            sel[b * Q + jj // H, b * QHp + jj] = 1.0

    return {
        "qk": jnp.asarray(qk_pad, jnp.float32),          # (QHp, C_in)
        "gid": jnp.asarray(gid.reshape(Rp, 1)),          # (Rp, 1) int32
        "hmask": jnp.asarray(hmask_rows, jnp.float32),   # (Rp, E)
        "wv_f": jnp.asarray(wv_f, jnp.float32),          # (C_in, E)
        "bv_f": jnp.asarray(bv_f, jnp.float32),          # (1, E)
        "woT": jnp.asarray(g["wo"].T, jnp.float32),      # (E, E_out)
        "sel": jnp.asarray(sel),                         # (B*Q, Rp)
        "bo": jnp.asarray(g["bo"], jnp.float32),         # (1, E_out)
        "dims": dict(num_heads=H, num_queries=Q, batch_size=B, QHp=QHp,
                     E=E, E_out=E_out, C_in=C_in),
    }


def gmt_pooling(x, batch, prep, *, tile_nodes=512, compute_dtype=jnp.bfloat16):
    """x: [N, C_in], batch: [N] int32 in [0, batch_size). Returns [B, Q, E_out].

    compute_dtype controls the operands of the two N-scaled MXU matmuls only;
    scores, softmax and all accumulation stay in float32.
    """
    dims = prep["dims"]
    B = dims["batch_size"]; Q = dims["num_queries"]; QHp = dims["QHp"]
    E = dims["E"]; E_out = dims["E_out"]; C_in = dims["C_in"]
    Rp = B * QHp
    N = x.shape[0]

    # Node tile: lane dim must be a multiple of 128.  ~512+ amortizes per-step
    # overhead; double-buffered x tiles + the (Rp, TN) score slab stay far
    # inside the scoped VMEM budget on every generation (incl. v7x's 64 MiB).
    tn = max(128, (int(tile_nodes) + 127) // 128 * 128)
    n_pad = pl.cdiv(N, tn) * tn
    grid = (n_pad // tn,)

    # Feature-major (lane-dense) node stream; padded nodes get graph id = B so
    # they never match any row and are masked out of the softmax.
    xT = jnp.zeros((C_in, n_pad), compute_dtype)
    xT = xT.at[:, :N].set(x.T.astype(compute_dtype))
    batch2d = jnp.full((1, n_pad), B, jnp.int32).at[0, :N].set(
        batch.astype(jnp.int32))

    qk = prep["qk"].astype(compute_dtype)

    inputs = (batch2d, xT, qk, prep["gid"], prep["hmask"], prep["wv_f"],
              prep["bv_f"], prep["woT"], prep["sel"], prep["bo"])

    in_specs = [
        pl.BlockSpec((1, tn), lambda n: (0, n)),          # graph ids (node tile)
        pl.BlockSpec((C_in, tn), lambda n: (0, n)),       # xT (node tile)
        pl.BlockSpec((QHp, C_in), lambda n: (0, 0)),      # folded queries
        pl.BlockSpec((Rp, 1), lambda n: (0, 0)),          # per-row graph id
        pl.BlockSpec((Rp, E), lambda n: (0, 0)),          # per-row head mask
        pl.BlockSpec((C_in, E), lambda n: (0, 0)),        # fused V weight
        pl.BlockSpec((1, E), lambda n: (0, 0)),           # fused V bias
        pl.BlockSpec((E, E_out), lambda n: (0, 0)),       # out-proj weight
        pl.BlockSpec((B * Q, Rp), lambda n: (0, 0)),      # head-sum selection
        pl.BlockSpec((1, E_out), lambda n: (0, 0)),       # out-proj bias
    ]
    out_specs = pl.BlockSpec((B * Q, E_out), lambda n: (0, 0))

    itemsize = np.dtype(compute_dtype).itemsize
    cost = pl.CostEstimate(
        flops=int(2 * C_in * n_pad * (QHp + Rp)),
        transcendentals=int(n_pad * Rp),
        bytes_accessed=int(n_pad * (C_in * itemsize + 4) + B * Q * E_out * 4),
    )

    out = pl.pallas_call(
        gmt_pool_kernel,
        out_shape=jax.ShapeDtypeStruct((B * Q, E_out), jnp.float32),
        grid_spec=pltpu.PrefetchScalarGridSpec(
            num_scalar_prefetch=0,
            grid=grid,
            in_specs=in_specs,
            out_specs=out_specs,
            scratch_shapes=[
                pltpu.VMEM((Rp, 1), jnp.float32),      # running max
                pltpu.VMEM((Rp, 1), jnp.float32),      # running denominator
                pltpu.VMEM((Rp, C_in), jnp.float32),   # running P @ x
            ],
        ),
        compiler_params=pltpu.CompilerParams(
            dimension_semantics=("arbitrary",),        # node axis is a reduction
            vmem_limit_bytes=32 * 1024 * 1024,
        ),
        cost_estimate=cost,
    )(*inputs)
    return out.reshape(B, Q, E_out)


def reference_numpy(x, batch, p, num_heads):
    """Pure-numpy mirror of the PyTorch forward (per-graph gather, unfused)."""
    xn = np.asarray(x)
    bn = np.asarray(batch)
    B = int(bn.max()) + 1
    Q, E = p["queries"].shape
    d = E // num_heads
    g = {k: np.asarray(v) for k, v in p.items()}
    outs = []
    for i in range(B):
        x_i = xn[bn == i]
        k = x_i @ g["wk"].T + g["bk"]
        v = x_i @ g["wv"].T + g["bv"]
        q2 = g["queries"] @ g["wqa"].T + g["bqa"]
        k2 = k @ g["wka"].T + g["bka"]
        v2 = v @ g["wva"].T + g["bva"]
        zs = []
        for h in range(num_heads):
            qh = q2[:, h * d:(h + 1) * d]
            kh = k2[:, h * d:(h + 1) * d]
            vh = v2[:, h * d:(h + 1) * d]
            s = qh @ kh.T / math.sqrt(d)
            s = s - s.max(-1, keepdims=True)
            pz = np.exp(s)
            pz = pz / pz.sum(-1, keepdims=True)
            zs.append(pz @ vh)
        z = np.concatenate(zs, axis=-1)
        outs.append(z @ g["wo"].T + g["bo"])
    return np.stack(outs)


if __name__ == "__main__":
    # Small, module-consistent shapes (ragged graphs exercise the masking).
    C_in = 16        # in_channels
    E = 32           # out_channels
    H = 4            # num_heads
    Q = 1            # num_queries
    B = 3            # number of graphs
    counts = [5, 9, 10]
    N = sum(counts)

    key = jax.random.PRNGKey(0)
    ks = jax.random.split(key, 16)

    def normal(k, shape, s=0.2):
        return jax.random.normal(k, shape, jnp.float32) * s

    params = {
        "queries": normal(ks[0], (Q, E), 1.0),          # torch.randn init
        "wk":  normal(ks[1], (E, C_in)), "bk":  normal(ks[2], (1, E)),
        "wv":  normal(ks[3], (E, C_in)), "bv":  normal(ks[4], (1, E)),
        "wqa": normal(ks[5], (E, E)),    "bqa": normal(ks[6], (1, E)),
        "wka": normal(ks[7], (E, E)),    "bka": normal(ks[8], (1, E)),
        "wva": normal(ks[9], (E, E)),    "bva": normal(ks[10], (1, E)),
        "wo":  normal(ks[11], (E, E)),   "bo":  normal(ks[12], (1, E)),
    }

    x = jax.random.normal(ks[13], (N, C_in), jnp.float32)
    batch = jnp.asarray(np.repeat(np.arange(B, dtype=np.int32), counts))

    prep = prepare_gmt_params(params, num_heads=H, batch_size=B)
    ref = reference_numpy(x, batch, params, H)

    # Exact path: f32 MXU operands + exact softmax reciprocal -> tight check.
    out32 = gmt_pooling(x, batch, prep, compute_dtype=jnp.float32)
    out32 = jax.block_until_ready(out32)
    np.testing.assert_allclose(np.asarray(out32), ref, rtol=2e-4, atol=2e-4)

    # Default fast path: bf16 operands for the N-scaled matmuls only
    # (scores / softmax / accumulation stay f32) -> bf16-level tolerance.
    out16 = gmt_pooling(x, batch, prep)
    out16 = jax.block_until_ready(out16)
    np.testing.assert_allclose(np.asarray(out16), ref, rtol=5e-2, atol=5e-2)

    print("KERNEL_OK")
</pallas_src>

<mosaic_0001>
module attributes {stable_mosaic.version = 11 : i64} {
  func.func @gmt_pool_kernel(%arg0: i32, %arg1: memref<1x512xi32, #tpu.memory_space<vmem>>, %arg2: memref<16x512xf32, #tpu.memory_space<vmem>>, %arg3: memref<8x16xf32, #tpu.memory_space<vmem>>, %arg4: memref<24x1xi32, #tpu.memory_space<vmem>>, %arg5: memref<24x32xf32, #tpu.memory_space<vmem>>, %arg6: memref<16x32xf32, #tpu.memory_space<vmem>>, %arg7: memref<1x32xf32, #tpu.memory_space<vmem>>, %arg8: memref<32x32xf32, #tpu.memory_space<vmem>>, %arg9: memref<3x24xf32, #tpu.memory_space<vmem>>, %arg10: memref<1x32xf32, #tpu.memory_space<vmem>>, %arg11: memref<3x32xf32, #tpu.memory_space<vmem>>, %arg12: memref<24x1xf32, #tpu.memory_space<vmem>>, %arg13: memref<24x1xf32, #tpu.memory_space<vmem>>, %arg14: memref<24x16xf32, #tpu.memory_space<vmem>>) attributes {dimension_semantics = [#tpu.dimension_semantics<arbitrary>], iteration_bounds = array<i64: 1>, scalar_prefetch = 0 : i64, scratch_operands = 3 : i64, tpu.core_type = #tpu.core_type<tc>, window_params = [{transform_indices = @transform_0, window_bounds = array<i64: 1, 512>}, {transform_indices = @transform_1, window_bounds = array<i64: 16, 512>}, {pipeline_mode = #tpu.pipeline_mode<synchronous>, transform_indices = @transform_2, window_bounds = array<i64: 8, 16>}, {pipeline_mode = #tpu.pipeline_mode<synchronous>, transform_indices = @transform_3, window_bounds = array<i64: 24, 1>}, {pipeline_mode = #tpu.pipeline_mode<synchronous>, transform_indices = @transform_4, window_bounds = array<i64: 24, 32>}, {pipeline_mode = #tpu.pipeline_mode<synchronous>, transform_indices = @transform_5, window_bounds = array<i64: 16, 32>}, {pipeline_mode = #tpu.pipeline_mode<synchronous>, transform_indices = @transform_6, window_bounds = array<i64: 1, 32>}, {pipeline_mode = #tpu.pipeline_mode<synchronous>, transform_indices = @transform_7, window_bounds = array<i64: 32, 32>}, {pipeline_mode = #tpu.pipeline_mode<synchronous>, transform_indices = @transform_8, window_bounds = array<i64: 3, 24>}, {pipeline_mode = #tpu.pipeline_mode<synchronous>, transform_indices = @transform_9, window_bounds = array<i64: 1, 32>}, {pipeline_mode = #tpu.pipeline_mode<synchronous>, transform_indices = @transform_10, window_bounds = array<i64: 3, 32>}]} {
    %c0_i32 = arith.constant 0 : i32
    %0 = arith.cmpi eq, %arg0, %c0_i32 : i32
    %1 = arith.extui %0 : i1 to i32
    %c0_i32_0 = arith.constant 0 : i32
    %2 = arith.cmpi ne, %1, %c0_i32_0 : i32
    scf.if %2 {
      %cst_29 = arith.constant -1.000000e+30 : f32
      %42 = vector.broadcast %cst_29 : f32 to vector<24x1xf32>
      %c0_30 = arith.constant 0 : index
      %c0_31 = arith.constant 0 : index
      %43 = vector.load %arg12[%c0_30, %c0_31] : memref<24x1xf32, #tpu.memory_space<vmem>>, vector<24x1xf32>
      tpu.vector_store %arg12[%c0_30, %c0_31], %42 {strides = array<i32>} : memref<24x1xf32, #tpu.memory_space<vmem>>, vector<24x1xf32>,
      %cst_32 = arith.constant 0.000000e+00 : f32
      %44 = vector.broadcast %cst_32 : f32 to vector<24x1xf32>
      %c0_33 = arith.constant 0 : index
      %c0_34 = arith.constant 0 : index
      %45 = vector.load %arg13[%c0_33, %c0_34] : memref<24x1xf32, #tpu.memory_space<vmem>>, vector<24x1xf32>
      tpu.vector_store %arg13[%c0_33, %c0_34], %44 {strides = array<i32>} : memref<24x1xf32, #tpu.memory_space<vmem>>, vector<24x1xf32>,
      %cst_35 = arith.constant 0.000000e+00 : f32
      %46 = vector.broadcast %cst_35 : f32 to vector<24x16xf32>
      %c0_36 = arith.constant 0 : index
      %c0_37 = arith.constant 0 : index
      %47 = vector.load %arg14[%c0_36, %c0_37] : memref<24x16xf32, #tpu.memory_space<vmem>>, vector<24x16xf32>
      tpu.vector_store %arg14[%c0_36, %c0_37], %46 {strides = array<i32>} : memref<24x16xf32, #tpu.memory_space<vmem>>, vector<24x16xf32>,
    } else {
    }
    %c0 = arith.constant 0 : index
    %c0_1 = arith.constant 0 : index
    %3 = vector.load %arg3[%c0, %c0_1] : memref<8x16xf32, #tpu.memory_space<vmem>>, vector<8x16xf32>
    %c0_2 = arith.constant 0 : index
    %c0_3 = arith.constant 0 : index
    %4 = vector.load %arg2[%c0_2, %c0_3] : memref<16x512xf32, #tpu.memory_space<vmem>>, vector<16x512xf32>
    %cst = arith.constant dense<0.000000e+00> : vector<8x512xf32>
    %5 = tpu.matmul %3, %4, %cst {dimension_numbers = #tpu.dot_dimension_numbers<[1], [0], [0], [1], [0, 0, 1, 1], [], []>, precision = #tpu.contract_precision<fp32>} : vector<8x16xf32>, vector<16x512xf32>, vector<8x512xf32> -> vector<8x512xf32>
    %6 = tpu.concatenate %5, %5, %5 in 0 : vector<8x512xf32>, vector<8x512xf32>, vector<8x512xf32> -> vector<24x512xf32>
    %c0_4 = arith.constant 0 : index
    %c0_5 = arith.constant 0 : index
    %7 = vector.load %arg1[%c0_4, %c0_5] : memref<1x512xi32, #tpu.memory_space<vmem>>, vector<1x512xi32>
    %c0_6 = arith.constant 0 : index
    %c0_7 = arith.constant 0 : index
    %8 = vector.load %arg4[%c0_6, %c0_7] : memref<24x1xi32, #tpu.memory_space<vmem>>, vector<24x1xi32>
    %9 = vector.broadcast %7 : vector<1x512xi32> to vector<24x512xi32>
    %10 = vector.broadcast %8 : vector<24x1xi32> to vector<24x512xi32>
    %11 = arith.cmpi eq, %9, %10 : vector<24x512xi32>
    %cst_8 = arith.constant -1.000000e+30 : f32
    %12 = vector.broadcast %cst_8 : f32 to vector<24x512xf32>
    %13 = arith.select %11, %6, %12 : vector<24x512xi1>, vector<24x512xf32>
    %c0_9 = arith.constant 0 : index
    %c0_10 = arith.constant 0 : index
    %14 = vector.load %arg12[%c0_9, %c0_10] : memref<24x1xf32, #tpu.memory_space<vmem>>, vector<24x1xf32>
    %cst_11 = arith.constant dense<0xFF800000> : vector<24xf32>
    %15 = vector.multi_reduction <maximumf>, %13, %cst_11 [1] : vector<24x512xf32> to vector<24xf32>
    %16 = vector.shape_cast %15 : vector<24xf32> to vector<24x1xf32>
    %17 = arith.maximumf %14, %16 : vector<24x1xf32>
    %18 = arith.subf %14, %17 : vector<24x1xf32>
    %19 = math.exp %18 : vector<24x1xf32>
    %20 = vector.broadcast %17 : vector<24x1xf32> to vector<24x512xf32>
    %21 = arith.subf %13, %20 : vector<24x512xf32>
    %22 = math.exp %21 : vector<24x512xf32>
    %cst_12 = arith.constant 0.000000e+00 : f32
    %23 = vector.broadcast %cst_12 : f32 to vector<24x512xf32>
    %24 = arith.select %11, %22, %23 : vector<24x512xi1>, vector<24x512xf32>
    %c0_13 = arith.constant 0 : index
    %c0_14 = arith.constant 0 : index
    %25 = vector.load %arg13[%c0_13, %c0_14] : memref<24x1xf32, #tpu.memory_space<vmem>>, vector<24x1xf32>
    %26 = arith.mulf %19, %25 : vector<24x1xf32>
    %cst_15 = arith.constant dense<0.000000e+00> : vector<24xf32>
    %27 = vector.multi_reduction <add>, %24, %cst_15 [1] : vector<24x512xf32> to vector<24xf32>
    %28 = vector.shape_cast %27 : vector<24xf32> to vector<24x1xf32>
    %29 = arith.addf %26, %28 : vector<24x1xf32>
    %c0_16 = arith.constant 0 : index
    %c0_17 = arith.constant 0 : index
    %30 = vector.load %arg13[%c0_16, %c0_17] : memref<24x1xf32, #tpu.memory_space<vmem>>, vector<24x1xf32>
    tpu.vector_store %arg13[%c0_16, %c0_17], %29 {strides = array<i32>} : memref<24x1xf32, #tpu.memory_space<vmem>>, vector<24x1xf32>,
    %c0_18 = arith.constant 0 : index
    %c0_19 = arith.constant 0 : index
    %31 = vector.load %arg2[%c0_18, %c0_19] : memref<16x512xf32, #tpu.memory_space<vmem>>, vector<16x512xf32>
    %cst_20 = arith.constant dense<0.000000e+00> : vector<24x16xf32>
    %32 = tpu.matmul %24, %31, %cst_20 {dimension_numbers = #tpu.dot_dimension_numbers<[1], [1], [0], [0], [0, 0, 1, 0], [], []>, precision = #tpu.contract_precision<fp32>} : vector<24x512xf32>, vector<16x512xf32>, vector<24x16xf32> -> vector<24x16xf32>
    %c0_21 = arith.constant 0 : index
    %c0_22 = arith.constant 0 : index
    %33 = vector.load %arg14[%c0_21, %c0_22] : memref<24x16xf32, #tpu.memory_space<vmem>>, vector<24x16xf32>
    %34 = vector.broadcast %19 : vector<24x1xf32> to vector<24x16xf32>
    %35 = arith.mulf %34, %33 : vector<24x16xf32>
    %36 = arith.addf %35, %32 : vector<24x16xf32>
    %c0_23 = arith.constant 0 : index
    %c0_24 = arith.constant 0 : index
    %37 = vector.load %arg14[%c0_23, %c0_24] : memref<24x16xf32, #tpu.memory_space<vmem>>, vector<24x16xf32>
    tpu.vector_store %arg14[%c0_23, %c0_24], %36 {strides = array<i32>} : memref<24x16xf32, #tpu.memory_space<vmem>>, vector<24x16xf32>,
    %c0_25 = arith.constant 0 : index
    %c0_26 = arith.constant 0 : index
    %38 = vector.load %arg12[%c0_25, %c0_26] : memref<24x1xf32, #tpu.memory_space<vmem>>, vector<24x1xf32>
    tpu.vector_store %arg12[%c0_25, %c0_26], %17 {strides = array<i32>} : memref<24x1xf32, #tpu.memory_space<vmem>>, vector<24x1xf32>,
    %c0_i32_27 = arith.constant 0 : i32
    %39 = arith.cmpi eq, %arg0, %c0_i32_27 : i32
    %40 = arith.extui %39 : i1 to i32
    %c0_i32_28 = arith.constant 0 : i32
    %41 = arith.cmpi ne, %40, %c0_i32_28 : i32
    scf.if %41 {
      %c0_29 = arith.constant 0 : index
      %c0_30 = arith.constant 0 : index
      %42 = vector.load %arg13[%c0_29, %c0_30] : memref<24x1xf32, #tpu.memory_space<vmem>>, vector<24x1xf32>
      %cst_31 = arith.constant 0.000000e+00 : f32
      %43 = vector.broadcast %cst_31 : f32 to vector<24x1xf32>
      %44 = arith.cmpf ogt, %42, %43 : vector<24x1xf32>
      %45 = arith.extui %44 : vector<24x1xi1> to vector<24x1xi32>
      %46 = arith.sitofp %45 : vector<24x1xi32> to vector<24x1xf32>
      %cst_32 = arith.constant 0.000000e+00 : f32
      %47 = vector.broadcast %cst_32 : f32 to vector<24x1xf32>
      %48 = arith.cmpf ogt, %42, %47 : vector<24x1xf32>
      %cst_33 = arith.constant 1.000000e+00 : f32
      %49 = vector.broadcast %cst_33 : f32 to vector<24x1xf32>
      %50 = arith.divf %49, %42 : vector<24x1xf32>
      %cst_34 = arith.constant 0.000000e+00 : f32
      %51 = vector.broadcast %cst_34 : f32 to vector<24x1xf32>
      %52 = arith.select %48, %50, %51 : vector<24x1xi1>, vector<24x1xf32>
      %c0_35 = arith.constant 0 : index
      %c0_36 = arith.constant 0 : index
      %53 = vector.load %arg14[%c0_35, %c0_36] : memref<24x16xf32, #tpu.memory_space<vmem>>, vector<24x16xf32>
      %54 = vector.broadcast %52 : vector<24x1xf32> to vector<24x16xf32>
      %55 = arith.mulf %53, %54 : vector<24x16xf32>
      %c0_37 = arith.constant 0 : index
      %c0_38 = arith.constant 0 : index
      %56 = vector.load %arg6[%c0_37, %c0_38] : memref<16x32xf32, #tpu.memory_space<vmem>>, vector<16x32xf32>
      %cst_39 = arith.constant dense<0.000000e+00> : vector<24x32xf32>
      %57 = tpu.matmul %55, %56, %cst_39 {dimension_numbers = #tpu.dot_dimension_numbers<[1], [0], [0], [1], [0, 0, 1, 1], [], []>, precision = #tpu.contract_precision<fp32>} : vector<24x16xf32>, vector<16x32xf32>, vector<24x32xf32> -> vector<24x32xf32>
      %c0_40 = arith.constant 0 : index
      %c0_41 = arith.constant 0 : index
      %58 = vector.load %arg7[%c0_40, %c0_41] : memref<1x32xf32, #tpu.memory_space<vmem>>, vector<1x32xf32>
      %59 = vector.broadcast %46 : vector<24x1xf32> to vector<24x32xf32>
      %60 = vector.broadcast %58 : vector<1x32xf32> to vector<24x32xf32>
      %61 = arith.mulf %59, %60 : vector<24x32xf32>
      %62 = arith.addf %57, %61 : vector<24x32xf32>
      %c0_42 = arith.constant 0 : index
      %c0_43 = arith.constant 0 : index
      %63 = vector.load %arg5[%c0_42, %c0_43] : memref<24x32xf32, #tpu.memory_space<vmem>>, vector<24x32xf32>
      %64 = arith.mulf %62, %63 : vector<24x32xf32>
      %c0_44 = arith.constant 0 : index
      %c0_45 = arith.constant 0 : index
      %65 = vector.load %arg8[%c0_44, %c0_45] : memref<32x32xf32, #tpu.memory_space<vmem>>, vector<32x32xf32>
      %cst_46 = arith.constant dense<0.000000e+00> : vector<24x32xf32>
      %66 = tpu.matmul %64, %65, %cst_46 {dimension_numbers = #tpu.dot_dimension_numbers<[1], [0], [0], [1], [0, 0, 1, 1], [], []>, precision = #tpu.contract_precision<fp32>} : vector<24x32xf32>, vector<32x32xf32>, vector<24x32xf32> -> vector<24x32xf32>
      %c0_47 = arith.constant 0 : index
      %c0_48 = arith.constant 0 : index
      %67 = vector.load %arg9[%c0_47, %c0_48] : memref<3x24xf32, #tpu.memory_space<vmem>>, vector<3x24xf32>
      %cst_49 = arith.constant dense<0.000000e+00> : vector<3x32xf32>
      %68 = tpu.matmul %67, %66, %cst_49 {dimension_numbers = #tpu.dot_dimension_numbers<[1], [0], [0], [1], [0, 0, 1, 1], [], []>, precision = #tpu.contract_precision<fp32>} : vector<3x24xf32>, vector<24x32xf32>, vector<3x32xf32> -> vector<3x32xf32>
      %c0_50 = arith.constant 0 : index
      %c0_51 = arith.constant 0 : index
      %69 = vector.load %arg10[%c0_50, %c0_51] : memref<1x32xf32, #tpu.memory_space<vmem>>, vector<1x32xf32>
      %70 = vector.broadcast %69 : vector<1x32xf32> to vector<3x32xf32>
      %71 = arith.addf %68, %70 : vector<3x32xf32>
      %c0_52 = arith.constant 0 : index
      %c0_53 = arith.constant 0 : index
      %72 = vector.load %arg11[%c0_52, %c0_53] : memref<3x32xf32, #tpu.memory_space<vmem>>, vector<3x32xf32>
      tpu.vector_store %arg11[%c0_52, %c0_53], %71 {strides = array<i32>} : memref<3x32xf32, #tpu.memory_space<vmem>>, vector<3x32xf32>,
    } else {
    }
    return
  }
  func.func @transform_0(%arg0: i32) -> (i32, i32) {
    %c0_i32 = arith.constant 0 : i32
    %c0_i32_0 = arith.constant 0 : i32
    return %c0_i32, %arg0 : i32, i32
  }
  func.func @transform_1(%arg0: i32) -> (i32, i32) {
    %c0_i32 = arith.constant 0 : i32
    %c0_i32_0 = arith.constant 0 : i32
    return %c0_i32, %arg0 : i32, i32
  }
  func.func @transform_2(%arg0: i32) -> (i32, i32) {
    %c0_i32 = arith.constant 0 : i32
    %c0_i32_0 = arith.constant 0 : i32
    %c0_i32_1 = arith.constant 0 : i32
    return %c0_i32, %c0_i32_0 : i32, i32
  }
  func.func @transform_3(%arg0: i32) -> (i32, i32) {
    %c0_i32 = arith.constant 0 : i32
    %c0_i32_0 = arith.constant 0 : i32
    %c0_i32_1 = arith.constant 0 : i32
    return %c0_i32, %c0_i32_0 : i32, i32
  }
  func.func @transform_4(%arg0: i32) -> (i32, i32) {
    %c0_i32 = arith.constant 0 : i32
    %c0_i32_0 = arith.constant 0 : i32
    %c0_i32_1 = arith.constant 0 : i32
    return %c0_i32, %c0_i32_0 : i32, i32
  }
  func.func @transform_5(%arg0: i32) -> (i32, i32) {
    %c0_i32 = arith.constant 0 : i32
    %c0_i32_0 = arith.constant 0 : i32
    %c0_i32_1 = arith.constant 0 : i32
    return %c0_i32, %c0_i32_0 : i32, i32
  }
  func.func @transform_6(%arg0: i32) -> (i32, i32) {
    %c0_i32 = arith.constant 0 : i32
    %c0_i32_0 = arith.constant 0 : i32
    %c0_i32_1 = arith.constant 0 : i32
    return %c0_i32, %c0_i32_0 : i32, i32
  }
  func.func @transform_7(%arg0: i32) -> (i32, i32) {
    %c0_i32 = arith.constant 0 : i32
    %c0_i32_0 = arith.constant 0 : i32
    %c0_i32_1 = arith.constant 0 : i32
    return %c0_i32, %c0_i32_0 : i32, i32
  }
  func.func @transform_8(%arg0: i32) -> (i32, i32) {
    %c0_i32 = arith.constant 0 : i32
    %c0_i32_0 = arith.constant 0 : i32
    %c0_i32_1 = arith.constant 0 : i32
    return %c0_i32, %c0_i32_0 : i32, i32
  }
  func.func @transform_9(%arg0: i32) -> (i32, i32) {
    %c0_i32 = arith.constant 0 : i32
    %c0_i32_0 = arith.constant 0 : i32
    %c0_i32_1 = arith.constant 0 : i32
    return %c0_i32, %c0_i32_0 : i32, i32
  }
  func.func @transform_10(%arg0: i32) -> (i32, i32) {
    %c0_i32 = arith.constant 0 : i32
    %c0_i32_0 = arith.constant 0 : i32
    %c0_i32_1 = arith.constant 0 : i32
    return %c0_i32, %c0_i32_0 : i32, i32
  }
}

</mosaic_0001>

<bundles_post_ra>
// kernel: tpu_custom_call.1
= control target key start
LH: loop header
LB: loop body
LE: loop exit
PB: predicated region body
PF: predicated region fallthrough
CT: control target
= control target key end

     0   :  { %15 = vsyncpa [#allocation6], 0  ;;  %s5898_s0 = inlined_call_operand.hbm [shape: s32[1,512], index: 0, kind: input, shape index: {}]   ;;  %s5899_s1 = inlined_call_operand.hbm [shape: f32[16,512], index: 1, kind: input, shape index: {}]   ;;  %s5900_s2 = inlined_call_operand.hbm [shape: f32[8,16], index: 2, kind: input, shape index: {}]   ;;  %s5901_s3 = inlined_call_operand.vmem [shape: s32[24,1], index: 3, kind: input, shape index: {}]   ;;  %s5902_s4 = inlined_call_operand.hbm [shape: f32[24,32], index: 4, kind: input, shape index: {}]   ;;  %s5903_s5 = inlined_call_operand.vmem [shape: f32[16,32], index: 5, kind: input, shape index: {}]   ;;  %s5904_s6 = inlined_call_operand.vmem [shape: f32[1,32], index: 6, kind: input, shape index: {}]   ;;  %s5905_s7 = inlined_call_operand.vmem [shape: f32[32,32], index: 7, kind: input, shape index: {}]   ;;  %s5906_s8 = inlined_call_operand.vmem [shape: f32[3,24], index: 8, kind: input, shape index: {}]   ;;  %s5907_s9 = inlined_call_operand.vmem [shape: f32[1,32], index: 9, kind: input, shape index: {}]   ;;  %s5908_s10 = inlined_call_operand.hbm [shape: f32[3,32], index: 10, kind: output, shape index: {}]  }
   0x1   :  { %16 = vsyncpa [#allocation9], 0 }
   0x2   :  { %17 = vsyncpa [#allocation12], 0 }
   0x3   :  { %18 = vsyncpa [#allocation7], 0  ;;  %s5015_s13 = smov [#allocation8]   ;;  %s4897_s17 = scalar_lea.hbm %s5899_s1, 1024 }
   0x4   :  { %s34_s14 = sshll.u32 %s5015_s13, 4  ;;  %p4898_p0 = scmp.ne.s32.totalorder %s5899_s1, %s4897_s17  ;;  %s35_s14 = int_to_ptr.vmem [resolvable:$true] %s34_s14 }
   0x5   :  { %p4901_p1 = scmp.lt.u32.totalorder %s4897_s17, %s5899_s1 }
   0x7   :  { %p4903_p2 = pnand %p4901_p1, %p4898_p0 }
   0x9   :  { %4906 = shalt.err (!%p4903_p2)
}
   0xa   :  { %s4907_s22 = scalar_lea.vmem %s35_s14, 1024  ;;  %p4912_p4 = scmp.lt.s32.totalorder %s35_s14, %s35_s14 }
   0xb   :  { %p4908_p3 = scmp.ne.s32.totalorder %s35_s14, %s4907_s22  ;;  %p4913_p5 = scmp.lt.s32.totalorder %s4907_s22, %s4907_s22 }
   0xd   :  { %p4914_p6 = por %p4913_p5, %p4912_p4 }
   0xf   :  { %p4915_p7 = pnand %p4914_p6, %p4908_p3 }
  0x11   :  { %4918 = shalt.err (!%p4915_p7)
}
  0x12   :  { %s5016_s23 = smov 512   ;;  %s5017_s24 = smov 32  }
  0x13   :  { %40 = dma.hbm_to_vmem [thread:$0]  %s5899_s1, 1024, %s35_s14, [#allocation9], %s5016_s23, %s5016_s23, %s5017_s24  }
  0x14   :  { %s5018_s27 = smov [#allocation5]   ;;  %s5019_s29 = smov [#allocation10]  }
  0x15   :  { %s25_s28 = sshll.u32 %s5018_s27, 4  ;;  %s47_s30 = sshll.u32 %s5019_s29, 4  ;;  %s26_s28 = int_to_ptr.vmem [resolvable:$true] %s25_s28  ;;  %s48_s30 = int_to_ptr.vmem [resolvable:$true] %s47_s30 }
  0x16   :  { %s4919_s13 = scalar_lea.hbm %s5898_s0, 64 }
  0x17   :  { %p4920_p8 = scmp.ne.s32.totalorder %s5898_s0, %s4919_s13  ;;  %p4923_p9 = scmp.lt.u32.totalorder %s4919_s13, %s5898_s0 }
  0x19   :  { %p4925_p10 = pnand %p4923_p9, %p4920_p8 }
  0x1b   :  { %4928 = shalt.err (!%p4925_p10)
}
  0x1c   :  { %s4929_s1 = scalar_lea.vmem %s26_s28, 64  ;;  %p4934_p12 = scmp.lt.s32.totalorder %s26_s28, %s26_s28 }
  0x1d   :  { %p4930_p11 = scmp.ne.s32.totalorder %s26_s28, %s4929_s1  ;;  %p4935_p13 = scmp.lt.s32.totalorder %s4929_s1, %s4929_s1 }
  0x1f   :  { %p4936_p0 = por %p4935_p13, %p4934_p12 }
  0x21   :  { %p4937_p1 = pnand %p4936_p0, %p4930_p11 }
  0x23   :  { %4940 = shalt.err (!%p4937_p1)
}
  0x24   :  { %28 = dma.hbm_to_vmem [thread:$0]  %s5898_s0, 64, %s26_s28, [#allocation6]  }
  0x25   :  { %s4941_s22 = scalar_lea.hbm %s5900_s2, 128 }
  0x26   :  { %p4942_p2 = scmp.ne.s32.totalorder %s5900_s2, %s4941_s22  ;;  %p4945_p3 = scmp.lt.u32.totalorder %s4941_s22, %s5900_s2 }
  0x28   :  { %p4947_p4 = pnand %p4945_p3, %p4942_p2 }
  0x2a   :  { %4950 = shalt.err (!%p4947_p4)
}
  0x2b   :  { %s4951_s27 = scalar_lea.vmem %s48_s30, 128  ;;  %p4956_p6 = scmp.lt.s32.totalorder %s48_s30, %s48_s30 }
  0x2c   :  { %p4952_p5 = scmp.ne.s32.totalorder %s48_s30, %s4951_s27  ;;  %p4957_p7 = scmp.lt.s32.totalorder %s4951_s27, %s4951_s27 }
  0x2e   :  { %p4958_p8 = por %p4957_p7, %p4956_p6 }
  0x30   :  { %p4959_p9 = pnand %p4958_p8, %p4952_p5 }
  0x32   :  { %4962 = shalt.err (!%p4959_p9)
}
  0x33   :  { %50 = dma.hbm_to_vmem [thread:$0]  %s5900_s2, 128, %s48_s30, [#allocation9]  }
  0x34   :  { %s5020_s29 = smov [#allocation11]   ;;  %s4963_s15 = scalar_lea.hbm %s5902_s4, 384 }
  0x35   :  { %s58_s11 = sshll.u32 %s5020_s29, 4  ;;  %p4964_p10 = scmp.ne.s32.totalorder %s5902_s4, %s4963_s15  ;;  %s59_s11 = int_to_ptr.vmem [resolvable:$true] %s58_s11 }
  0x36   :  { %p4967_p11 = scmp.lt.u32.totalorder %s4963_s15, %s5902_s4 }
  0x38   :  { %p4969_p12 = pnand %p4967_p11, %p4964_p10 }
  0x3a   :  { %4972 = shalt.err (!%p4969_p12)
}
  0x3b   :  { %s4973_s14 = scalar_lea.vmem %s59_s11, 384  ;;  %p4978_p0 = scmp.lt.s32.totalorder %s59_s11, %s59_s11 }
  0x3c   :  { %p4974_p13 = scmp.ne.s32.totalorder %s59_s11, %s4973_s14  ;;  %p4979_p1 = scmp.lt.s32.totalorder %s4973_s14, %s4973_s14 }
  0x3e   :  { %p4980_p2 = por %p4979_p1, %p4978_p0 }
  0x40   :  { %p4981_p3 = pnand %p4980_p2, %p4974_p13 }
  0x42   :  { %4984 = shalt.err (!%p4981_p3)
}
  0x43   :  { %s5021_s2 = smov 128   ;;  %s5022_s30 = smov 8  }
  0x44   :  { %64 = dma.hbm_to_vmem [thread:$0]  %s5902_s4, 384, %s59_s11, [#allocation12], %s5021_s2, %s5021_s2, %s5022_s30  }
  0x45   :  { %5007 = dma.done.wait [#allocation6], 64  }
  0x46   :  { %5008 = vsyncadd [#allocation6], 4294967232 }
  0x47   :  { %5009 = dma.done.wait [#allocation9], 1152  }
  0x48   :  { %5010 = vsyncadd [#allocation9], 4294966144 }
  0x49   :  { %5011 = dma.done.wait [#allocation12], 384  }
  0x4a   :  { %5012 = vsyncadd [#allocation12], 4294966912  ;;  %vm98_vm0 = vcmask 130048   ;;  %v5023_v0 = vmov 0.0   ;;  %v5024_v1 = vmov 0   ;;  %v104_v2 = vld [vmem:[#allocation8 + $0x8] sm:$0xff] }
  0x4b   :  { %183 = vmatprep.mubr.f32.mxu0 %v5023_v0  ;;  %674 = vmatprep.mubr.f32.mxu1 %v5023_v0  ;;  %99 = vst.msk [vmem:[#allocation4] sm:$0xff] %vm98_vm0, %v5023_v0  ;;  %100 = vst.msk [vmem:[#allocation4 + $0x8] sm:$0xff] %vm98_vm0, %v5023_v0  ;;  %v108_v3 = vld [vmem:[#allocation8 + $0x28] sm:$0xff]  ;;  %v106_v4 = vld [vmem:[#allocation8 + $0x18] sm:$0xff]  ;;  %v115_v5 = vand.u32 4294901760, %v104_v2  ;;  %vm91_vm1 = vcmask 7168  }
  0x4c   :  { %101 = vst.msk [vmem:[#allocation4 + $0x10] sm:$0xff] %vm98_vm0, %v5023_v0  ;;  %4859 = vset.pattern.permute.xlu0 %v5024_v1  ;;  %4860 = vset.pattern.permute.xlu1 %v5024_v1  ;;  %v119_v6 = vand.u32 4294901760, %v108_v3  ;;  %v110_v7 = vld [vmem:[#allocation8 + $0x38] sm:$0xff]  ;;  %v606_v8 = vand.u32 4294901760, %v106_v4  ;;  %v103_v9 = vld [vmem:[#allocation8] sm:$0xff]  ;;  %v105_v14 = vld [vmem:[#allocation8 + $0x10] sm:$0xff] }
  0x4d   :  { %v107_v10 = vld [vmem:[#allocation8 + $0x20] sm:$0xff]  ;;  %v610_v11 = vand.u32 4294901760, %v110_v7  ;;  %v117_v12 = vand.u32 4294901760, %v103_v9  ;;  %v109_v15 = vld [vmem:[#allocation8 + $0x30] sm:$0xff]  ;;  %v5142_v18 = vsub.f32 %v104_v2, %v115_v5  ;;  %v608_v28 = vand.u32 4294901760, %v105_v14  ;;  %95 = vst.msk [vmem:[#allocation3] sm:$0xff] %vm91_vm1, %v5023_v0 }
  0x4e   :  { %v121_v13 = vand.u32 4294901760, %v107_v10  ;;  %v102_v16 = vld [vmem:[#allocation10] sm:$0xff]  ;;  %v5140_v17 = vpack.c.bf16 %v119_v6, %v115_v5  ;;  %v5144_v19 = vsub.f32 %v108_v3, %v119_v6  ;;  %v5146_v20 = vsub.f32 %v106_v4, %v606_v8  ;;  %v1098_v21 = vld [vmem:[%s5901_s3] sm:$0xff]  ;;  %96 = vst.msk [vmem:[#allocation3 + $0x8] sm:$0xff] %vm91_vm1, %v5023_v0  ;;  %97 = vst.msk [vmem:[#allocation3 + $0x10] sm:$0xff] %vm91_vm1, %v5023_v0  ;;  %s5028_s14 = smov [#allocation13]  }
  0x4f   :  { %v1100_v22 = vld [vmem:[%s5901_s3 + $0x10] sm:$0xff]  ;;  %v5154_v23 = vpack.c.bf16 %v610_v11, %v606_v8  ;;  %v5156_v24 = vsub.f32 %v110_v7, %v610_v11  ;;  %v5160_v26 = vsub.f32 %v103_v9, %v117_v12  ;;  %1118 = vperm.xlu0 %4859, %v1098_v21   ;;  %v612_v29 = vand.u32 4294901760, %v109_v15  ;;  %v1099_v31 = vld [vmem:[%s5901_s3 + $0x8] sm:$0xff]  ;;  %s4238_s2 = sshll.u32 %s5028_s14, 4  ;;  %s4239_s2 = int_to_ptr.vmem [resolvable:$true] %s4238_s2 }
  0x50   :  { %v5158_v25 = vpack.c.bf16 %v121_v13, %v117_v12  ;;  %4585 = vmatprep.subr.bf16.mxu0 %v5140_v17  ;;  %v5163_v27 = vsub.f32 %v107_v10, %v121_v13  ;;  %v113_v30 = vsel %vm98_vm0, %v102_v16, 0  ;;  %1124 = vperm.xlu1 %4860, %v1100_v22   ;;  %v197_v33 = vand.u32 4294901760, %v5142_v18  ;;  %s4985_s30 = scalar_lea.vmem %s4239_s2, 64  ;;  %p4990_p5 = scmp.lt.s32.totalorder %s4239_s2, %s4239_s2 }
  0x51   :  { %4609 = vmatprep.subr.bf16.mxu1 %v5154_v23  ;;  %v5171_v32 = vand.u32 4294901760, %v113_v30  ;;  %v209_v34 = vand.u32 4294901760, %v5144_v19  ;;  %v688_v35 = vand.u32 4294901760, %v5146_v20  ;;  %v5176_v36 = vpack.c.bf16 %v612_v29, %v608_v28  ;;  %p4986_p4 = scmp.ne.s32.totalorder %s4239_s2, %s4985_s30  ;;  %p4991_p6 = scmp.lt.s32.totalorder %s4985_s30, %s4985_s30 }
  0x52   :  { %4587 = vmatpush1.bf16.msra.mxu0 %v5158_v25  ;;  %v5178_v37 = vsub.f32 %v105_v14, %v608_v28  ;;  %v5180_v38 = vsub.f32 %v109_v15, %v612_v29  ;;  %v700_v39 = vand.u32 4294901760, %v5156_v24  ;;  %v198_v41 = vsub.f32 %v5142_v18, %v197_v33 }
  0x53   :  { %v185_v40 = vsub.f32 %v113_v30, %v5171_v32  ;;  %v210_v42 = vsub.f32 %v5144_v19, %v209_v34  ;;  %v689_v43 = vsub.f32 %v5146_v20, %v688_v35  ;;  %1121 = vperm.xlu0 %4859, %v1099_v31   ;;  %4611 = vmatpush1.bf16.msra.mxu1 %v5176_v36  ;;  %v203_v45 = vand.u32 4294901760, %v5160_v26  ;;  %p4992_p7 = por %p4991_p6, %p4990_p5 }
  0x54   :  { %v701_v44 = vsub.f32 %v5156_v24, %v700_v39  ;;  %v215_v46 = vand.u32 4294901760, %v5163_v27  ;;  %v694_v47 = vand.u32 4294901760, %v5178_v37  ;;  %v199_v49 = vand.u32 4294901760, %v198_v41 }
  0x55   :  { %v186_v48 = vand.u32 4294901760, %v185_v40  ;;  %v211_v50 = vand.u32 4294901760, %v210_v42  ;;  %v690_v51 = vand.u32 4294901760, %v689_v43  ;;  %v204_v53 = vsub.f32 %v5160_v26, %v203_v45  ;;  %p4993_p8 = pnand %p4992_p7, %p4986_p4 }
  0x56   :  { %v702_v52 = vand.u32 4294901760, %v701_v44  ;;  %v216_v54 = vsub.f32 %v5163_v27, %v215_v46  ;;  %v695_v55 = vsub.f32 %v5178_v37, %v694_v47  ;;  %v706_v58 = vand.u32 4294901760, %v5180_v38 }
  0x57   :  { %v187_v56 = vsub.f32 %v185_v40, %v186_v48  ;;  %v5195_v57 = vpack.c.bf16 %v211_v50, %v199_v49  ;;  %v205_v60 = vand.u32 4294901760, %v204_v53  ;;  %v4592_v2 = vpack.c.bf16 %v5144_v19, %v5142_v18  ;;  %v1097_v19 = vld [vmem:[#allocation5] sm:$0xf] }
  0x58   :  { %v5198_v59 = vpack.c.bf16 %v702_v52, %v690_v51  ;;  %v217_v61 = vand.u32 4294901760, %v216_v54  ;;  %v696_v63 = vand.u32 4294901760, %v695_v55  ;;  %v707_v1 = vsub.f32 %v5180_v38, %v706_v58 }
  0x59   :  { %v188_v62 = vand.u32 4294901760, %v187_v56  ;;  %4589 = vmatprep.subr.bf16.mxu0 %v5195_v57  ;;  %v5211_v5 = vpack.c.bf16 %v5156_v24, %v5146_v20  ;;  %v4594_v7 = vpack.c.bf16 %v5163_v27, %v5160_v26  ;;  %v5222_v8 = vpack.c.bf16 %v5180_v38, %v5178_v37 }
  0x5a   :  { %4613 = vmatprep.subr.bf16.mxu1 %v5198_v59  ;;  %v5205_v3 = vpack.c.bf16 %v217_v61, %v205_v60  ;;  %v708_v4 = vand.u32 4294901760, %v707_v1  ;;  %v4600_v9 = vpack.c.bf16 %v209_v34, %v197_v33  ;;  %v5231_v10 = vpack.c.bf16 %v700_v39, %v688_v35 }
  0x5b   :  { %189 = vmatmul.mubr.f32.vlgmr.msra.gmra.mrb[0].mxu0 %v188_v62  ;;  %680 = vmatmul.mubr.f32.vlgmr.msra.gmra.mrb[0].mxu1 %v188_v62  ;;  %v5238_v11 = vpack.c.bf16 %v215_v46, %v203_v45  ;;  %v5240_v12 = vpack.c.bf16 %v706_v58, %v694_v47  ;;  %v5025_v13 = vmov -1e+30   ;;  %v1101_v14 = vlaneseq }
  0x5c   :  { %4591 = vmatpush1.bf16.msra.mxu0 %v5205_v3  ;;  %279 = vmatprep.mubr.f32.mxu0 %v5023_v0  ;;  %v5213_v6 = vpack.c.bf16 %v708_v4, %v696_v63  ;;  %93 = vst.msk [vmem:[#allocation2 + $0x8] sm:$0xff] %vm91_vm1, %v5025_v13  ;;  %92 = vst.msk [vmem:[#allocation2] sm:$0xff] %vm91_vm1, %v5025_v13 }
  0x5d   :  { %770 = vmatprep.mubr.f32.mxu1 %v5023_v0  ;;  %4593 = vmatprep.subr.bf16.mxu0 %v4592_v2  ;;  %94 = vst.msk [vmem:[#allocation2 + $0x10] sm:$0xff] %vm91_vm1, %v5025_v13  ;;  %v1102_v15 = vshrl.u32 %v1101_v14, 7 }
  0x5e   :  { %4615 = vmatpush1.bf16.msra.mxu1 %v5213_v6 }
  0x5f   :  { %4617 = vmatprep.subr.bf16.mxu1 %v5211_v5  ;;  %v1103_v18 = vsub.s32 0, %v1102_v15  ;;  %v1111_v20 = vsub.s32 2, %v1102_v15  ;;  %v1107_v21 = vsub.s32 1, %v1102_v15  ;;  %v1115_v22 = vsub.s32 3, %v1102_v15 }
  0x61   :  { %v5270_v24 = vrot.slane %v1097_v19, %v1103_v18  ;;  %v5274_v27 = vrot.slane %v1097_v19, %v1111_v20  ;;  %v5276_v28 = vrot.slane %v1097_v19, %v1107_v21  ;;  %v5280_v30 = vrot.slane %v1097_v19, %v1115_v22 }
  0x63   :  { %281 = vmatmul.mubr.f32.vlgmr.msra.gmra.mrb[0].mxu0 %v5171_v32  ;;  %772 = vmatmul.mubr.f32.vlgmr.msra.gmra.mrb[0].mxu1 %v5171_v32  ;;  %v5362_v58 = vld [vmem:[#allocation2] sm:$0xff] }
  0x64   :  { %4595 = vmatpush1.bf16.msra.mxu0 %v4594_v7  ;;  %4619 = vmatpush1.bf16.msra.mxu1 %v5222_v8  ;;  %v5370_v1 = vld [vmem:[#allocation2 + $0x10] sm:$0xff] }
  0x65   :  { %359 = vmatprep.mubr.f32.mxu0 %v5023_v0  ;;  %850 = vmatprep.mubr.f32.mxu1 %v5023_v0 }
  0x66   :  { %4597 = vmatprep.subr.bf16.mxu0 %v5140_v17  ;;  %4621 = vmatprep.subr.bf16.mxu1 %v5154_v23 }
  0x6b   :  { %362 = vmatmul.mubr.f32.vlgmr.msra.gmra.mrb[0].mxu0 %v185_v40  ;;  %853 = vmatmul.mubr.f32.vlgmr.msra.gmra.mrb[0].mxu1 %v185_v40 }
  0x6c   :  { %4599 = vmatpush1.bf16.msra.mxu0 %v5158_v25  ;;  %4623 = vmatpush1.bf16.msra.mxu1 %v5176_v36 }
  0x6d   :  { %436 = vmatprep.mubr.f32.mxu0 %v5023_v0  ;;  %927 = vmatprep.mubr.f32.mxu1 %v5023_v0 }
  0x6e   :  { %4601 = vmatprep.subr.bf16.mxu0 %v4600_v9  ;;  %4625 = vmatprep.subr.bf16.mxu1 %v5231_v10 }
  0x73   :  { %440 = vmatmul.mubr.f32.vlgmr.msra.gmra.mrb[0].mxu0 %v186_v48  ;;  %931 = vmatmul.mubr.f32.vlgmr.msra.gmra.mrb[0].mxu1 %v186_v48 }
  0x74   :  { %4603 = vmatpush1.bf16.msra.mxu0 %v5238_v11  ;;  %4627 = vmatpush1.bf16.msra.mxu1 %v5240_v12 }
  0x75   :  { %522 = vmatprep.mubr.f32.mxu0 %v5023_v0  ;;  %1013 = vmatprep.mubr.f32.mxu1 %v5023_v0 }
  0x76   :  { %4605 = vmatprep.subr.bf16.mxu0 %v5140_v17  ;;  %4629 = vmatprep.subr.bf16.mxu1 %v5154_v23 }
  0x7b   :  { %524 = vmatmul.mubr.f32.vlgmr.msra.gmra.mrb[0].mxu0 %v5171_v32  ;;  %1015 = vmatmul.mubr.f32.vlgmr.msra.gmra.mrb[0].mxu1 %v5171_v32 }
  0x7c   :  { %4607 = vmatpush1.bf16.msra.mxu0 %v5158_v25  ;;  %4631 = vmatpush1.bf16.msra.mxu1 %v5176_v36 }
  0x7d   :  { %598 = vmatprep.mubr.f32.mxu0 %v5023_v0  ;;  %1089 = vmatprep.mubr.f32.mxu1 %v5023_v0 }
  0x7e   :  { %4641 = vmatprep.subr.bf16.mxu0 %v4592_v2  ;;  %4633 = vmatprep.subr.bf16.mxu1 %v5140_v17 }
  0x83   :  { %600 = vmatmul.mubr.f32.vlgmr.msra.gmra.mrb[0].mxu0 %v5171_v32  ;;  %1091 = vmatmul.mubr.f32.vlgmr.msra.gmra.mrb[0].mxu1 %v5171_v32 }
  0x85   :  { %4643 = vmatpush1.bf16.xpose.msra.mxu0 %v4594_v7  ;;  %4635 = vmatpush1.bf16.xpose.msra.mxu1 %v5158_v25 }
  0x86   :  { %4649 = vmatprep.subr.bf16.mxu0 %v4600_v9  ;;  %4637 = vmatprep.subr.bf16.mxu1 %v5195_v57  ;;  %v5360_v57 = vld [vmem:[#allocation2 + $0x8] sm:$0xff] }
  0xce   :  { %v5268_v16 = vpop.permute.xlu0 %1118 }
  0xcf   :  { %v5278_v29 = vpop.permute.xlu1 %1124  ;;  %vm1126_vm2 = vcmp.eq.s32.totalorder %v5270_v24, %v5268_v16  ;;  %vm1128_vm4 = vcmp.eq.s32.totalorder %v5274_v27, %v5268_v16  ;;  %vm1127_vm8 = vcmp.eq.s32.totalorder %v5276_v28, %v5268_v16  ;;  %vm1129_vm11 = vcmp.eq.s32.totalorder %v5280_v30, %v5268_v16 }
  0xd0   :  { %vm1134_vm6 = vcmp.eq.s32.totalorder %v5270_v24, %v5278_v29  ;;  %vm1136_vm7 = vcmp.eq.s32.totalorder %v5274_v27, %v5278_v29  ;;  %vm1135_vm10 = vcmp.eq.s32.totalorder %v5276_v28, %v5278_v29  ;;  %vm1137_vm13 = vcmp.eq.s32.totalorder %v5280_v30, %v5278_v29 }
  0xd2   :  { %v5272_v26 = vpop.permute.xlu0 %1121 }
  0xd3   :  { %vm1130_vm3 = vcmp.eq.s32.totalorder %v5270_v24, %v5272_v26  ;;  %vm1132_vm5 = vcmp.eq.s32.totalorder %v5274_v27, %v5272_v26  ;;  %vm1131_vm9 = vcmp.eq.s32.totalorder %v5276_v28, %v5272_v26  ;;  %vm1133_vm12 = vcmp.eq.s32.totalorder %v5280_v30, %v5272_v26 }
 0x156   :  { %v601_v31 = vpop.f32.mrb[0].mxu0  ;;  %v1092_v32 = vpop.f32.mrb[0].mxu1 }
 0x157   :  { %v5301_v33 = vsel %vm1126_vm2, %v601_v31, -1e+30  ;;  %v1142_v34 = vsel %vm1130_vm3, %v601_v31, -1e+30  ;;  %v5313_v35 = vsel %vm1128_vm4, %v1092_v32, -1e+30 }
 0x158   :  { %v1144_v37 = vsel %vm1132_vm5, %v1092_v32, -1e+30  ;;  %v5325_v38 = vsel %vm1134_vm6, %v601_v31, -1e+30  ;;  %v5330_v39 = vsel %vm1136_vm7, %v1092_v32, -1e+30  ;;  %v1153_v46 = vmax.f32 %v5301_v33, %v5313_v35 }
 0x159   :  { %v603_v40 = vpop.f32.mrb[1].mxu0  ;;  %v1094_v41 = vpop.f32.mrb[1].mxu1  ;;  %v1158_v42 = vmax.f32 %v1142_v34, %v1144_v37  ;;  %v1163_v54 = vmax.f32 %v5325_v38, %v5330_v39 }
 0x15a   :  { %v1139_v43 = vsel %vm1127_vm8, %v603_v40, -1e+30  ;;  %v1143_v44 = vsel %vm1131_vm9, %v603_v40, -1e+30  ;;  %v5341_v45 = vsel %vm1135_vm10, %v603_v40, -1e+30 }
 0x15b   :  { %v1141_v47 = vsel %vm1129_vm11, %v1094_v41, -1e+30  ;;  %v1145_v48 = vsel %vm1133_vm12, %v1094_v41, -1e+30  ;;  %v5354_v49 = vsel %vm1137_vm13, %v1094_v41, -1e+30 }
 0x15c   :  { %v1159_v50 = vmax.f32 %v1143_v44, %v1145_v48  ;;  %v1154_v51 = vmax.f32 %v1139_v43, %v1141_v47  ;;  %v1164_v55 = vmax.f32 %v5341_v45, %v5354_v49 }
 0x15e   :  { %v1160_v52 = vmax.f32 %v1158_v42, %v1159_v50  ;;  %v1155_v53 = vmax.f32 %v1153_v46, %v1154_v51  ;;  %v1165_v56 = vmax.f32 %v1163_v54, %v1164_v55 }
 0x160   :  { %1161 = vmax.xlane.f32.xlu0 %v1160_v52  ;;  %1156 = vmax.xlane.f32.xlu1 %v1155_v53 }
 0x164   :  { %1166 = vmax.xlane.f32.xlu0 %v1165_v56 }
 0x1ed   :  { %v1162_v60 = vpop.xlane.xlu0 %1161  ;;  %v1157_v61 = vpop.xlane.xlu1 %1156 }
 0x1ee   :  { %v5365_v62 = vmax.f32 %v5360_v57, %v1162_v60  ;;  %v5368_v63 = vmax.f32 %v5362_v58, %v1157_v61 }
 0x1f0   :  { %v1172_v2 = vsub.f32 %v5360_v57, %v5365_v62  ;;  %2527 = vst.msk [vmem:[#allocation2 + $0x8] sm:$0xff] %vm91_vm1, %v5365_v62  ;;  %v1171_v4 = vsub.f32 %v5362_v58, %v5368_v63  ;;  %2526 = vst.msk [vmem:[#allocation2] sm:$0xff] %vm91_vm1, %v5368_v63  ;;  %1187 = vperm.xlu0 %4859, %v5365_v62   ;;  %1182 = vperm.xlu1 %4860, %v5368_v63  }
 0x1f1   :  { %v1167_v7 = vpop.xlane.xlu0 %1166 }
 0x1f2   :  { %v5383_v9 = vmax.f32 %v5370_v1, %v1167_v7 }
 0x1f4   :  { %v1173_v13 = vsub.f32 %v5370_v1, %v5383_v9  ;;  %2528 = vst.msk [vmem:[#allocation2 + $0x10] sm:$0xff] %vm91_vm1, %v5383_v9  ;;  %1192 = vperm.xlu1 %4860, %v5383_v9  }
 0x26f   :  { %v1188_v14 = vpop.permute.xlu0 %1187  ;;  %v1183_v15 = vpop.permute.xlu1 %1182 }
 0x270   :  { %v1199_v18 = vsub.f32 %v1142_v34, %v1188_v14  ;;  %v1200_v19 = vsub.f32 %v1143_v44, %v1188_v14  ;;  %v1201_v20 = vsub.f32 %v1144_v37, %v1188_v14  ;;  %v1202_v21 = vsub.f32 %v1145_v48, %v1188_v14 }
 0x271   :  { %v1195_v22 = vsub.f32 %v5301_v33, %v1183_v15  ;;  %v1196_v31 = vsub.f32 %v1139_v43, %v1183_v15  ;;  %v1197_v42 = vsub.f32 %v5313_v35, %v1183_v15  ;;  %v1198_v50 = vsub.f32 %v1141_v47, %v1183_v15 }
 0x272   :  { %v1215_v32 = vmul.f32 1.442695, %v1199_v18  ;;  %v1217_v40 = vmul.f32 1.442695, %v1200_v19  ;;  %v1219_v41 = vmul.f32 1.442695, %v1201_v20 }
 0x273   :  { %v1221_v46 = vmul.f32 1.442695, %v1202_v21  ;;  %v1193_v51 = vpop.permute.xlu1 %1192  ;;  %v1207_v52 = vmul.f32 1.442695, %v1195_v22  ;;  %v1209_v34 = vmul.f32 1.442695, %v1196_v31 }
 0x274   :  { %4861 = vpow2.f32 %v1215_v32  ;;  %v1203_v53 = vsub.f32 %v5325_v38, %v1193_v51  ;;  %v1204_v37 = vsub.f32 %v5341_v45, %v1193_v51  ;;  %v1211_v44 = vmul.f32 1.442695, %v1197_v42 }
 0x275   :  { %4863 = vpow2.f32 %v1217_v40  ;;  %v1205_v33 = vsub.f32 %v5330_v39, %v1193_v51  ;;  %v1213_v43 = vmul.f32 1.442695, %v1198_v50  ;;  %v1206_v35 = vsub.f32 %v5354_v49, %v1193_v51 }
 0x276   :  { %4865 = vpow2.f32 %v1219_v41  ;;  %v1223_v48 = vmul.f32 1.442695, %v1203_v53  ;;  %v1225_v47 = vmul.f32 1.442695, %v1204_v37 }
 0x277   :  { %4867 = vpow2.f32 %v1221_v46  ;;  %v1227_v54 = vmul.f32 1.442695, %v1205_v33  ;;  %v1229_v38 = vmul.f32 1.442695, %v1206_v35 }
 0x278   :  { %4869 = vpow2.f32 %v1207_v52 }
 0x279   :  { %4871 = vpow2.f32 %v1209_v34 }
 0x27a   :  { %4873 = vpow2.f32 %v1211_v44 }
 0x27b   :  { %4875 = vpow2.f32 %v1213_v43 }
 0x27c   :  { %4877 = vpow2.f32 %v1223_v48 }
 0x27d   :  { %4879 = vpow2.f32 %v1225_v47 }
 0x27e   :  { %v4862_v55 = vpop.eup %4861  ;;  %4881 = vpow2.f32 %v1227_v54 }
 0x27f   :  { %v4864_v45 = vpop.eup %4863  ;;  %v1235_v39 = vsel %vm1130_vm3, %v4862_v55, 0.0  ;;  %4883 = vpow2.f32 %v1229_v38  ;;  %vm3754_vm3 = vcmask 195584  }
 0x280   :  { %v4866_v56 = vpop.eup %4865  ;;  %v1236_v49 = vsel %vm1131_vm9, %v4864_v45, 0.0  ;;  %v5423_v40 = vand.u32 4294901760, %v1235_v39 }
 0x281   :  { %v4868_v60 = vpop.eup %4867  ;;  %v1254_v61 = vadd.f32 %v1236_v49, %v1235_v39  ;;  %v5402_v7 = vand.u32 4294901760, %v1236_v49  ;;  %v5407_v15 = vsel %vm1132_vm5, %v4866_v56, 0.0 }
 0x282   :  { %v4870_v14 = vpop.eup %4869  ;;  %v5421_v32 = vsel %vm1133_vm12, %v4868_v60, 0.0  ;;  %v5444_v35 = vsub.f32 %v1235_v39, %v5423_v40  ;;  %v5529_v9 = vand.u32 4294901760, %v5407_v15 }
 0x283   :  { %v4872_v18 = vpop.eup %4871  ;;  %v1231_v19 = vsel %vm1126_vm2, %v4870_v14, 0.0  ;;  %v1255_v20 = vadd.f32 %v1254_v61, %v5407_v15  ;;  %v5429_v50 = vsub.f32 %v1236_v49, %v5402_v7 }
 0x284   :  { %v4874_v21 = vpop.eup %4873  ;;  %v1232_v22 = vsel %vm1127_vm8, %v4872_v18, 0.0  ;;  %v5416_v31 = vand.u32 4294901760, %v1231_v19  ;;  %v1370_v18 = vand.u32 4294901760, %v5444_v35 }
 0x285   :  { %v4876_v41 = vpop.eup %4875  ;;  %v5425_v42 = vand.u32 4294901760, %v1232_v22  ;;  %v1256_v46 = vadd.f32 %v1255_v20, %v5421_v32  ;;  %v1249_v53 = vadd.f32 %v1232_v22, %v1231_v19  ;;  %v1233_v37 = vsel %vm1128_vm4, %v4874_v21, 0.0 }
 0x286   :  { %v4878_v51 = vpop.eup %4877  ;;  %v5432_v52 = vsub.f32 %v1231_v19, %v5416_v31  ;;  %v1234_v54 = vsel %vm1129_vm11, %v4876_v41, 0.0  ;;  %v1364_v55 = vand.u32 4294901760, %v5429_v50  ;;  %v1174_v21 = vmul.f32 1.442695, %v1171_v4 }
 0x287   :  { %v4880_v34 = vpop.eup %4879  ;;  %v5435_v26 = vsub.f32 %v1232_v22, %v5425_v42  ;;  %1257 = vadd.xlane.f32.xlu0 %v1256_v46  ;;  %v1239_v44 = vsel %vm1134_vm6, %v4878_v51, 0.0  ;;  %v1250_v43 = vadd.f32 %v1249_v53, %v1233_v37  ;;  %v5480_v19 = vand.u32 4294901760, %v1234_v54 }
 0x288   :  { %v4882_v33 = vpop.eup %4881  ;;  %v1240_v48 = vsel %vm1135_vm10, %v4880_v34, 0.0  ;;  %v5449_v47 = vand.u32 4294901760, %v1239_v44  ;;  %v1355_v61 = vand.u32 4294901760, %v5432_v52  ;;  %v1365_v20 = vsub.f32 %v5429_v50, %v1364_v55 }
 0x289   :  { %1573 = vmatprep.mubr.f32.mxu0 %v5435_v26  ;;  %v1349_v24 = vand.u32 4294901760, %v5435_v26  ;;  %v5456_v38 = vand.u32 4294901760, %v1240_v48  ;;  %v4884_v45 = vpop.eup %4883  ;;  %v1251_v39 = vadd.f32 %v1250_v43, %v1234_v54  ;;  %v1259_v28 = vadd.f32 %v1240_v48, %v1239_v44 }
 0x28a   :  { %1576 = vmatmul.mubr.f32.vlgmr.msra.gmra.mrb[2].mxu0 %v5432_v52  ;;  %v5471_v49 = vsel %vm1136_vm7, %v4882_v33, 0.0  ;;  %v5476_v14 = vsub.f32 %v1239_v44, %v5449_v47  ;;  %v1242_v27 = vsel %vm1137_vm13, %v4884_v45, 0.0  ;;  %v1356_v41 = vsub.f32 %v5432_v52, %v1355_v61 }
 0x28b   :  { %1582 = vmatprep.mubr.f32.mxu0 %v5429_v50  ;;  %v1350_v56 = vsub.f32 %v5435_v26, %v1349_v24  ;;  %v5465_v16 = vsub.f32 %v1240_v48, %v5456_v38  ;;  %4651 = vmatpush1.bf16.xpose.msra.mxu0 %v5238_v11  ;;  %v1260_v60 = vadd.f32 %v1259_v28, %v5471_v49  ;;  %v5497_v29 = vand.u32 4294901760, %v1233_v37 }
 0x28c   :  { %1252 = vadd.xlane.f32.xlu1 %v1251_v39  ;;  %4657 = vmatprep.subr.bf16.mxu0 %v5154_v23  ;;  %v1357_v30 = vand.u32 4294901760, %v1356_v41  ;;  %v1371_v58 = vsub.f32 %v5444_v35, %v1370_v18  ;;  %v1385_v63 = vand.u32 4294901760, %v5476_v14  ;;  %v5504_v4 = vand.u32 4294901760, %v5421_v32 }
 0x28d   :  { %v1351_v11 = vand.u32 4294901760, %v1350_v56  ;;  %v1261_v22 = vadd.f32 %v1260_v60, %v1242_v27  ;;  %v1379_v46 = vand.u32 4294901760, %v5465_v16  ;;  %v5507_v51 = vsub.f32 %v1234_v54, %v5480_v19 }
 0x28e   :  { %1585 = vmatmul.mubr.f32.gmra.mrb[4].mxu0 %v5444_v35  ;;  %v1366_v53 = vand.u32 4294901760, %v1365_v20  ;;  %4885 = vpow2.f32 %v1174_v21  ;;  %v1178_v44 = vmul.f32 1.442695, %v1173_v13  ;;  %v5518_v33 = vsub.f32 %v1233_v37, %v5497_v29 }
 0x28f   :  { %1352 = vmatprep.mubr.f32.mxu1 %v1351_v11  ;;  %1591 = vmatprep.mubr.f32.mxu0 %v5465_v16  ;;  %v1380_v34 = vsub.f32 %v5465_v16, %v1379_v46  ;;  %v1372_v43 = vand.u32 4294901760, %v1371_v58  ;;  %v1386_v48 = vsub.f32 %v5476_v14, %v1385_v63  ;;  %v5526_v1 = vsub.f32 %v5421_v32, %v5504_v4 }
 0x290   :  { %1262 = vadd.xlane.f32.xlu0 %v1261_v22  ;;  %1358 = vmatmul.mubr.f32.vlgmr.msra.gmra.mrb[2].mxu1 %v1357_v30  ;;  %v1959_v54 = vand.u32 4294901760, %v5507_v51  ;;  %4887 = vpow2.f32 %v1178_v44  ;;  %v5533_v37 = vand.u32 4294901760, %v1242_v27  ;;  %v1965_v32 = vand.u32 4294901760, %v5518_v33 }
 0x291   :  { %1367 = vmatprep.mubr.f32.mxu1 %v1366_v53  ;;  %4639 = vmatpush1.bf16.xpose.msra.mxu1 %v5205_v3  ;;  %v1381_v13 = vand.u32 4294901760, %v1380_v34  ;;  %v1176_v3 = vmul.f32 1.442695, %v1172_v2  ;;  %v1387_v45 = vand.u32 4294901760, %v1386_v48  ;;  %v5544_v39 = vsub.f32 %v5407_v15, %v5529_v9 }
 0x292   :  { %1594 = vmatmul.mubr.f32.gmra.mrb[6].mxu0 %v5476_v14  ;;  %4645 = vmatprep.subr.bf16.mxu1 %v5140_v17  ;;  %v5547_v28 = vand.u32 4294901760, %v5471_v49  ;;  %v1960_v57 = vsub.f32 %v5507_v51, %v1959_v54  ;;  %v1974_v62 = vand.u32 4294901760, %v5526_v1  ;;  %v5555_v2 = vsub.f32 %v1242_v27, %v5533_v37 }
 0x293   :  { %1778 = vmatprep.mubr.f32.mxu0 %v5425_v42  ;;  %4889 = vpow2.f32 %v1176_v3  ;;  %v1966_v56 = vsub.f32 %v5518_v33, %v1965_v32  ;;  %v1980_v27 = vand.u32 4294901760, %v5544_v39  ;;  %vm4230_vm4 = vcmask 256000  }
 0x294   :  { %1373 = vmatmul.mubr.f32.gmra.mrb[4].mxu1 %v1372_v43  ;;  %v1961_v60 = vand.u32 4294901760, %v1960_v57  ;;  %v1975_v11 = vsub.f32 %v5526_v1, %v1974_v62  ;;  %v1989_v20 = vand.u32 4294901760, %v5555_v2 }
 0x295   :  { %1382 = vmatprep.mubr.f32.mxu1 %v1381_v13  ;;  %v1967_v21 = vand.u32 4294901760, %v1966_v56  ;;  %v1981_v41 = vsub.f32 %v5544_v39, %v1980_v27 }
 0x296   :  { %1780 = vmatmul.mubr.f32.vlgmr.msra.gmra.mrb[8].mxu0 %v5416_v31  ;;  %v1976_v22 = vand.u32 4294901760, %v1975_v11  ;;  %v1990_v58 = vsub.f32 %v5555_v2, %v1989_v20 }
 0x297   :  { %1785 = vmatprep.mubr.f32.mxu0 %v5402_v7  ;;  %4659 = vmatpush1.bf16.xpose.msra.mxu0 %v5176_v36  ;;  %v1982_v34 = vand.u32 4294901760, %v1981_v41 }
 0x298   :  { %4665 = vmatprep.subr.bf16.mxu0 %v5211_v5  ;;  %1388 = vmatmul.mubr.f32.gmra.mrb[6].mxu1 %v1387_v45  ;;  %v5560_v15 = vpop.eup %4885  ;;  %v5567_v5 = vsub.f32 %v5471_v49, %v5547_v28 }
 0x299   :  { %1478 = vmatprep.mubr.f32.mxu1 %v5425_v42 }
 0x29a   :  { %1787 = vmatmul.mubr.f32.gmra.mrb[10].mxu0 %v5423_v40  ;;  %v5578_v49 = vpop.eup %4887  ;;  %v1995_v30 = vand.u32 4294901760, %v5567_v5 }
 0x29b   :  { %1792 = vmatprep.mubr.f32.mxu0 %v5456_v38 }
 0x29c   :  { %1480 = vmatmul.mubr.f32.vlgmr.msra.gmra.mrb[8].mxu1 %v5416_v31  ;;  %v1996_v44 = vsub.f32 %v5567_v5, %v1995_v30 }
 0x29d   :  { %2504 = vperm.xlu1 %4860, %v5560_v15   ;;  %1485 = vmatprep.mubr.f32.mxu1 %v5402_v7  ;;  %v4890_v53 = vpop.eup %4889 }
 0x29e   :  { %1794 = vmatmul.mubr.f32.gmra.mrb[12].mxu0 %v5449_v47  ;;  %4647 = vmatpush1.bf16.xpose.msra.mxu1 %v5158_v25  ;;  %v1997_v43 = vand.u32 4294901760, %v1996_v44 }
 0x29f   :  { %1962 = vmatprep.mubr.f32.mxu0 %v1961_v60  ;;  %4653 = vmatprep.subr.bf16.mxu1 %v5140_v17  ;;  %v1991_v17 = vand.u32 4294901760, %v1990_v58 }
 0x2a0   :  { %1487 = vmatmul.mubr.f32.gmra.mrb[10].mxu1 %v5423_v40 }
 0x2a1   :  { %2514 = vperm.xlu1 %4860, %v5578_v49   ;;  %1492 = vmatprep.mubr.f32.mxu1 %v5456_v38 }
 0x2a2   :  { %1968 = vmatmul.mubr.f32.vlgmr.msra.gmra.mrb[14].mxu0 %v1967_v21 }
 0x2a3   :  { %1977 = vmatprep.mubr.f32.mxu0 %v1976_v22  ;;  %4667 = vmatpush1.bf16.xpose.msra.mxu0 %v5222_v8 }
 0x2a4   :  { %4673 = vmatprep.subr.bf16.mxu0 %v5231_v10  ;;  %1494 = vmatmul.mubr.f32.gmra.mrb[12].mxu1 %v5449_v47 }
 0x2a5   :  { %1670 = vmatprep.mubr.f32.mxu1 %v1349_v24 }
 0x2a6   :  { %2509 = vperm.xlu0 %4859, %v4890_v53   ;;  %1983 = vmatmul.mubr.f32.gmra.mrb[16].mxu0 %v1982_v34 }
 0x2a7   :  { %1992 = vmatprep.mubr.f32.mxu0 %v1991_v17 }
 0x2a8   :  { %1674 = vmatmul.mubr.f32.vlgmr.msra.gmra.mrb[14].mxu1 %v1355_v61 }
 0x2a9   :  { %1681 = vmatprep.mubr.f32.mxu1 %v1364_v55  ;;  %4655 = vmatpush1.bf16.xpose.msra.mxu1 %v5158_v25 }
 0x2aa   :  { %1998 = vmatmul.mubr.f32.gmra.mrb[18].mxu0 %v1997_v43  ;;  %4661 = vmatprep.subr.bf16.mxu1 %v5198_v59 }
 0x2ab   :  { %2183 = vmatprep.mubr.f32.mxu0 %v5507_v51 }
 0x2ac   :  { %1685 = vmatmul.mubr.f32.gmra.mrb[16].mxu1 %v1370_v18 }
 0x2ad   :  { %1692 = vmatprep.mubr.f32.mxu1 %v1379_v46  ;;  %v2575_v46 = vld [vmem:[%s5903_s5 + $0x8] sm:$0xff] }
 0x2ae   :  { %2186 = vmatmul.mubr.f32.vlgmr.msra.gmra.mrb[20].mxu0 %v5518_v33 }
 0x2af   :  { %2192 = vmatprep.mubr.f32.mxu0 %v5526_v1  ;;  %4675 = vmatpush1.bf16.xpose.msra.mxu0 %v5240_v12  ;;  %v1245_v12 = vld [vmem:[#allocation3 + $0x10] sm:$0xff] }
 0x2b0   :  { %1696 = vmatmul.mubr.f32.gmra.mrb[18].mxu1 %v1385_v63  ;;  %v2614_v63 = vand.u32 4294901760, %v2575_v46 }
 0x2b1   :  { %1868 = vmatprep.mubr.f32.mxu1 %v5425_v42 }
 0x2b2   :  { %2195 = vmatmul.mubr.f32.gmra.mrb[22].mxu0 %v5544_v39  ;;  %v5677_v48 = vsub.f32 %v2575_v46, %v2614_v63 }
 0x2b3   :  { %2201 = vmatprep.mubr.f32.mxu0 %v5555_v2 }
 0x2b4   :  { %1870 = vmatmul.mubr.f32.vlgmr.msra.gmra.mrb[20].mxu1 %v5416_v31  ;;  %v1248_v31 = vmul.f32 %v5578_v49, %v1245_v12 }
 0x2b5   :  { %1875 = vmatprep.mubr.f32.mxu1 %v5402_v7  ;;  %4663 = vmatpush1.bf16.xpose.msra.mxu1 %v5213_v6  ;;  %v1243_v6 = vld [vmem:[#allocation3] sm:$0xff] }
 0x2b6   :  { %2204 = vmatmul.mubr.f32.gmra.mrb[24].mxu0 %v5567_v5  ;;  %4669 = vmatprep.subr.bf16.mxu1 %v5154_v23  ;;  %v1246_v8 = vmul.f32 %v5560_v15, %v1243_v6 }
 0x2b7   :  { %2388 = vmatprep.mubr.f32.mxu0 %v5480_v19 }
 0x2b8   :  { %1877 = vmatmul.mubr.f32.gmra.mrb[22].mxu1 %v5423_v40 }
 0x2b9   :  { %1882 = vmatprep.mubr.f32.mxu1 %v5456_v38 }
 0x2ba   :  { %2390 = vmatmul.mubr.f32.vlgmr.msra.gmra.mrb[26].mxu0 %v5497_v29 }
 0x2bb   :  { %2395 = vmatprep.mubr.f32.mxu0 %v5504_v4 }
 0x2bc   :  { %1884 = vmatmul.mubr.f32.gmra.mrb[24].mxu1 %v5449_v47 }
 0x2bd   :  { %2088 = vmatprep.mubr.f32.mxu1 %v5480_v19 }
 0x2be   :  { %2397 = vmatmul.mubr.f32.gmra.mrb[28].mxu0 %v5529_v9 }
 0x2bf   :  { %2402 = vmatprep.mubr.f32.mxu0 %v5533_v37 }
 0x2c0   :  { %2090 = vmatmul.mubr.f32.vlgmr.msra.gmra.mrb[26].mxu1 %v5497_v29 }
 0x2c1   :  { %2095 = vmatprep.mubr.f32.mxu1 %v5504_v4  ;;  %4671 = vmatpush1.bf16.xpose.msra.mxu1 %v5176_v36 }
 0x2c2   :  { %2404 = vmatmul.mubr.f32.gmra.mrb[30].mxu0 %v5547_v28  ;;  %4677 = vmatprep.subr.bf16.mxu1 %v5154_v23  ;;  %v1244_v23 = vld [vmem:[#allocation3 + $0x8] sm:$0xff] }
 0x2c3   :  { %v1247_v25 = vmul.f32 %v4890_v53, %v1244_v23 }
 0x2c4   :  { %2097 = vmatmul.mubr.f32.gmra.mrb[28].mxu1 %v5529_v9 }
 0x2c5   :  { %2102 = vmatprep.mubr.f32.mxu1 %v5533_v37 }
 0x2c8   :  { %2104 = vmatmul.mubr.f32.gmra.mrb[30].mxu1 %v5547_v28 }
 0x2c9   :  { %2280 = vmatprep.mubr.f32.mxu1 %v1959_v54 }
 0x2cc   :  { %2284 = vmatmul.mubr.f32.vlgmr.msra.gmra.mrb[32].mxu1 %v1965_v32 }
 0x2cd   :  { %2291 = vmatprep.mubr.f32.mxu1 %v1974_v62  ;;  %4679 = vmatpush1.bf16.xpose.msra.mxu1 %v5176_v36 }
 0x2d0   :  { %2295 = vmatmul.mubr.f32.gmra.mrb[34].mxu1 %v1980_v27 }
 0x2d1   :  { %2302 = vmatprep.mubr.f32.mxu1 %v1989_v20 }
 0x2d4   :  { %2306 = vmatmul.mubr.f32.gmra.mrb[36].mxu1 %v1995_v30 }
 0x2d5   :  { %2478 = vmatprep.mubr.f32.mxu1 %v5480_v19  ;;  %v2574_v19 = vld [vmem:[%s5903_s5] sm:$0xff] }
 0x2d8   :  { %2480 = vmatmul.mubr.f32.vlgmr.msra.gmra.mrb[38].mxu1 %v5497_v29  ;;  %v2611_v29 = vand.u32 4294901760, %v2574_v19 }
 0x2d9   :  { %2485 = vmatprep.mubr.f32.mxu1 %v5504_v4  ;;  %v5026_v4 = vmov 0.0|0.0  }
 0x2da   :  { %4680 = vmatprep.subr.bf16.mxu0 %v5026_v4  ;;  %v5673_v51 = vpack.c.bf16 %v2614_v63, %v2611_v29  ;;  %v5675_v33 = vsub.f32 %v2574_v19, %v2611_v29  ;;  %4698 = vmatprep.subr.bf16.mxu1 %v5026_v4 }
 0x2dc   :  { %2487 = vmatmul.mubr.f32.gmra.mrb[40].mxu1 %v5529_v9  ;;  %4682 = vmatpush3.bf16.msra.mxu0 %v5673_v51  ;;  %v2710_v1 = vand.u32 4294901760, %v5675_v33  ;;  %v2717_v9 = vand.u32 4294901760, %v5677_v48  ;;  %v4687_v45 = vpack.c.bf16 %v5677_v48, %v5675_v33 }
 0x2dd   :  { %2492 = vmatprep.mubr.f32.mxu1 %v5533_v37  ;;  %4683 = vmatprep.subr.bf16.mxu0 %v5026_v4 }
 0x2de   :  { %v2711_v13 = vsub.f32 %v5675_v33, %v2710_v1  ;;  %v2718_v54 = vsub.f32 %v5677_v48, %v2717_v9  ;;  %v5692_v30 = vpack.c.bf16 %v2717_v9, %v2710_v1  ;;  %v3162_v33 = vld [vmem:[%s5905_s7 + $0x8] sm:$0xff] }
 0x2e0   :  { %2494 = vmatmul.mubr.f32.gmra.mrb[42].mxu1 %v5547_v28  ;;  %v2712_v37 = vand.u32 4294901760, %v2711_v13  ;;  %v2719_v3 = vand.u32 4294901760, %v2718_v54 }
 0x2e2   :  { %v5688_v32 = vpack.c.bf16 %v2719_v3, %v2712_v37 }
 0x314   :  { %v1258_v36 = vpop.xlane.xlu0 %1257 }
 0x315   :  { %v1265_v59 = vadd.f32 %v1258_v36, %v1247_v25 }
 0x317   :  { %1269 = vst.msk [vmem:[#allocation3 + $0x8] sm:$0xff] %vm91_vm1, %v1265_v59 }
 0x319   :  { %v1253_v10 = vpop.xlane.xlu1 %1252 }
 0x31a   :  { %v1264_v7 = vadd.f32 %v1253_v10, %v1246_v8 }
 0x31c   :  { %1268 = vst.msk [vmem:[#allocation3] sm:$0xff] %vm91_vm1, %v1264_v7 }
 0x31d   :  { %v1263_v40 = vpop.xlane.xlu0 %1262 }
 0x31e   :  { %v1266_v42 = vadd.f32 %v1263_v40, %v1248_v31  ;;  %v2533_v50 = vld [vmem:[#allocation3 + $0x8] sm:$0xff] }
 0x31f   :  { %4891 = vrcp.f32 %v2533_v50  ;;  %vm2536_vm14 = vcmp.gt.f32.partialorder %v2533_v50, 0.0 }
 0x320   :  { %1270 = vst.msk [vmem:[#allocation3 + $0x10] sm:$0xff] %vm91_vm1, %v1266_v42  ;;  %v4250_v18 = vsel %vm2536_vm14, 1.0, %v5023_v0  ;;  %vm5027_vm1 = vmmov 0  }
 0x321   :  { %4354 = vmatprep.mubr.msk.f32.mxu0 %vm5027_vm1, %v5023_v0  ;;  %4436 = vmatprep.mubr.msk.f32.mxu1 %vm5027_vm1, %v5023_v0 }
 0x323   :  { %v2532_v52 = vld [vmem:[#allocation3] sm:$0xff] }
 0x324   :  { %4893 = vrcp.f32 %v2532_v52  ;;  %vm2535_vm15 = vcmp.gt.f32.partialorder %v2532_v52, 0.0 }
 0x325   :  { %v4249_v38 = vsel %vm2535_vm15, 1.0, %v5023_v0 }
 0x327   :  { %v2534_v26 = vld [vmem:[#allocation3 + $0x10] sm:$0xff] }
 0x328   :  { %4895 = vrcp.f32 %v2534_v26  ;;  %vm2537_vm2 = vcmp.gt.f32.partialorder %v2534_v26, 0.0 }
 0x329   :  { %v4892_v35 = vpop.eup %4891  ;;  %v4251_v61 = vsel %vm2537_vm2, 1.0, %v5023_v0 }
 0x32a   :  { %v2551_v47 = vsel %vm2536_vm14, %v4892_v35, 0.0 }
 0x32b   :  { %2563 = vperm.xlu0 %4859, %v2551_v47  }
 0x32e   :  { %v4894_v24 = vpop.eup %4893 }
 0x32f   :  { %v2550_v55 = vsel %vm2535_vm15, %v4894_v24, 0.0  ;;  %2579 = vperm.xlu0 %4859, %v4249_v38  }
 0x330   :  { %2558 = vperm.xlu1 %4860, %v2550_v55  }
 0x332   :  { %v4896_v16 = vpop.eup %4895 }
 0x333   :  { %v2552_v14 = vsel %vm2537_vm2, %v4896_v16, 0.0  ;;  %2589 = vperm.xlu0 %4859, %v4251_v61  }
 0x334   :  { %2568 = vperm.xlu1 %4860, %v2552_v14  }
 0x338   :  { %2584 = vperm.xlu1 %4860, %v4250_v18  }
 0x35d   :  { %v1577_v39 = vpop.f32.mrb[2].mxu0 }
 0x35e   :  { %v1579_v28 = vpop.f32.mrb[3].mxu0 }
 0x361   :  { %v1586_v57 = vpop.f32.mrb[4].mxu0 }
 0x362   :  { %v1588_v62 = vpop.f32.mrb[5].mxu0 }
 0x363   :  { %v1359_v2 = vpop.f32.mrb[2].mxu1 }
 0x364   :  { %v1361_v56 = vpop.f32.mrb[3].mxu1 }
 0x365   :  { %v1595_v15 = vpop.f32.mrb[6].mxu0 }
 0x366   :  { %v1597_v5 = vpop.f32.mrb[7].mxu0 }
 0x367   :  { %v1374_v60 = vpop.f32.mrb[4].mxu1 }
 0x368   :  { %v1376_v27 = vpop.f32.mrb[5].mxu1 }
 0x369   :  { %v1781_v11 = vpop.f32.mrb[8].mxu0 }
 0x36a   :  { %v1783_v20 = vpop.f32.mrb[9].mxu0 }
 0x36b   :  { %v1389_v49 = vpop.f32.mrb[6].mxu1 }
 0x36c   :  { %v1391_v22 = vpop.f32.mrb[7].mxu1 }
 0x36d   :  { %v1788_v21 = vpop.f32.mrb[10].mxu0 }
 0x36e   :  { %v1790_v41 = vpop.f32.mrb[11].mxu0 }
 0x36f   :  { %v1481_v58 = vpop.f32.mrb[8].mxu1 }
 0x370   :  { %v1482_v34 = vadd.f32 %v1481_v58, %v1359_v2  ;;  %v1483_v44 = vpop.f32.mrb[9].mxu1 }
 0x371   :  { %v1795_v53 = vpop.f32.mrb[12].mxu0 }
 0x372   :  { %v1797_v17 = vpop.f32.mrb[13].mxu0  ;;  %v1578_v43 = vadd.f32 %v1577_v39, %v1482_v34 }
 0x373   :  { %v1488_v23 = vpop.f32.mrb[10].mxu1 }
 0x374   :  { %v1489_v36 = vadd.f32 %v1488_v23, %v1374_v60  ;;  %v1490_v59 = vpop.f32.mrb[11].mxu1 }
 0x375   :  { %v1969_v25 = vpop.f32.mrb[14].mxu0 }
 0x376   :  { %v1971_v6 = vpop.f32.mrb[15].mxu0  ;;  %v1587_v8 = vadd.f32 %v1586_v57, %v1489_v36 }
 0x377   :  { %v1495_v10 = vpop.f32.mrb[12].mxu1 }
 0x378   :  { %v1496_v12 = vadd.f32 %v1495_v10, %v1389_v49  ;;  %v1497_v7 = vpop.f32.mrb[13].mxu1 }
 0x379   :  { %v1984_v31 = vpop.f32.mrb[16].mxu0 }
 0x37a   :  { %v1986_v40 = vpop.f32.mrb[17].mxu0  ;;  %v1596_v42 = vadd.f32 %v1595_v15, %v1496_v12 }
 0x37b   :  { %v1675_v50 = vpop.f32.mrb[14].mxu1 }
 0x37c   :  { %v1676_v52 = vadd.f32 %v1675_v50, %v1578_v43  ;;  %v1677_v26 = vpop.f32.mrb[15].mxu1 }
 0x37d   :  { %v1999_v35 = vpop.f32.mrb[18].mxu0 }
 0x37e   :  { %v2001_v47 = vpop.f32.mrb[19].mxu0  ;;  %v1782_v24 = vadd.f32 %v1781_v11, %v1676_v52 }
 0x37f   :  { %v1686_v38 = vpop.f32.mrb[16].mxu1 }
 0x380   :  { %v1687_v55 = vadd.f32 %v1686_v38, %v1587_v8  ;;  %v1688_v16 = vpop.f32.mrb[17].mxu1  ;;  %v2505_v38 = vpop.permute.xlu1 %2504 }
 0x381   :  { %v2187_v61 = vpop.f32.mrb[20].mxu0 }
 0x382   :  { %v2189_v14 = vpop.f32.mrb[21].mxu0  ;;  %v1789_v18 = vadd.f32 %v1788_v21, %v1687_v55 }
 0x383   :  { %v1697_v19 = vpop.f32.mrb[18].mxu1 }
 0x384   :  { %v1698_v46 = vadd.f32 %v1697_v19, %v1596_v42  ;;  %v1699_v29 = vpop.f32.mrb[19].mxu1  ;;  %v2500_v19 = vld [vmem:[#allocation4 + $0x8] sm:$0xff] }
 0x385   :  { %v2196_v63 = vpop.f32.mrb[22].mxu0 }
 0x386   :  { %v2198_v1 = vpop.f32.mrb[23].mxu0  ;;  %v1796_v9 = vadd.f32 %v1795_v53, %v1698_v46  ;;  %v2510_v46 = vpop.permute.xlu0 %2509 }
 0x387   :  { %v1871_v13 = vpop.f32.mrb[20].mxu1  ;;  %v2518_v1 = vmul.f32 %v2510_v46, %v2500_v19 }
 0x388   :  { %v1872_v54 = vadd.f32 %v1871_v13, %v1782_v24  ;;  %v1873_v37 = vpop.f32.mrb[21].mxu1  ;;  %v2499_v24 = vld [vmem:[#allocation4] sm:$0xff] }
 0x389   :  { %v2205_v3 = vpop.f32.mrb[24].mxu0  ;;  %v2515_v37 = vpop.permute.xlu1 %2514 }
 0x38a   :  { %v2207_v39 = vpop.f32.mrb[25].mxu0  ;;  %v1970_v28 = vadd.f32 %v1969_v25, %v1872_v54  ;;  %v2501_v54 = vld [vmem:[#allocation4 + $0x10] sm:$0xff] }
 0x38b   :  { %v1878_v57 = vpop.f32.mrb[22].mxu1 }
 0x38c   :  { %v1879_v62 = vadd.f32 %v1878_v57, %v1789_v18  ;;  %v1880_v2 = vpop.f32.mrb[23].mxu1 }
 0x38d   :  { %v2391_v15 = vpop.f32.mrb[26].mxu0 }
 0x38e   :  { %v2393_v56 = vpop.f32.mrb[27].mxu0  ;;  %v1985_v5 = vadd.f32 %v1984_v31, %v1879_v62 }
 0x38f   :  { %v1885_v60 = vpop.f32.mrb[24].mxu1 }
 0x390   :  { %v1886_v11 = vadd.f32 %v1885_v60, %v1796_v9  ;;  %v1887_v27 = vpop.f32.mrb[25].mxu1 }
 0x391   :  { %v2398_v20 = vpop.f32.mrb[28].mxu0 }
 0x392   :  { %v2400_v49 = vpop.f32.mrb[29].mxu0  ;;  %v2000_v21 = vadd.f32 %v1999_v35, %v1886_v11 }
 0x393   :  { %v2091_v22 = vpop.f32.mrb[26].mxu1 }
 0x394   :  { %v2092_v41 = vadd.f32 %v2091_v22, %v1970_v28  ;;  %v2093_v58 = vpop.f32.mrb[27].mxu1  ;;  %v2519_v28 = vmul.f32 %v2515_v37, %v2501_v54 }
 0x395   :  { %v2405_v53 = vpop.f32.mrb[30].mxu0 }
 0x396   :  { %v2407_v34 = vpop.f32.mrb[31].mxu0  ;;  %v2188_v44 = vadd.f32 %v2187_v61, %v2092_v41  ;;  %v2517_v61 = vmul.f32 %v2505_v38, %v2499_v24 }
 0x397   :  { %v2098_v17 = vpop.f32.mrb[28].mxu1 }
 0x398   :  { %v2099_v43 = vadd.f32 %v2098_v17, %v1985_v5  ;;  %v2100_v23 = vpop.f32.mrb[29].mxu1 }
 0x39a   :  { %v2197_v25 = vadd.f32 %v2196_v63, %v2099_v43 }
 0x39b   :  { %v2105_v36 = vpop.f32.mrb[30].mxu1 }
 0x39c   :  { %v2106_v59 = vadd.f32 %v2105_v36, %v2000_v21  ;;  %v2107_v6 = vpop.f32.mrb[31].mxu1 }
 0x39e   :  { %v2206_v8 = vadd.f32 %v2205_v3, %v2106_v59 }
 0x39f   :  { %v2285_v10 = vpop.f32.mrb[32].mxu1 }
 0x3a0   :  { %v2286_v12 = vadd.f32 %v2285_v10, %v2188_v44  ;;  %v2287_v7 = vpop.f32.mrb[33].mxu1 }
 0x3a2   :  { %v2392_v31 = vadd.f32 %v2391_v15, %v2286_v12 }
 0x3a3   :  { %v2296_v40 = vpop.f32.mrb[34].mxu1 }
 0x3a4   :  { %v2297_v42 = vadd.f32 %v2296_v40, %v2197_v25  ;;  %v2298_v50 = vpop.f32.mrb[35].mxu1  ;;  %v3164_v40 = vld [vmem:[%s5905_s7 + $0x18] sm:$0xff] }
 0x3a5   :  { %v3185_v50 = vand.u32 4294901760, %v3164_v40 }
 0x3a6   :  { %v2399_v52 = vadd.f32 %v2398_v20, %v2297_v42 }
 0x3a7   :  { %v2307_v26 = vpop.f32.mrb[36].mxu1  ;;  %v5772_v24 = vsub.f32 %v3164_v40, %v3185_v50 }
 0x3a8   :  { %v2308_v35 = vadd.f32 %v2307_v26, %v2206_v8  ;;  %v2309_v47 = vpop.f32.mrb[37].mxu1 }
 0x3a9   :  { %v3298_v46 = vand.u32 4294901760, %v5772_v24 }
 0x3aa   :  { %v2406_v55 = vadd.f32 %v2405_v53, %v2308_v35  ;;  %v2564_v11 = vpop.permute.xlu0 %2563 }
 0x3ab   :  { %v2481_v16 = vpop.f32.mrb[38].mxu1 }
 0x3ac   :  { %v2482_v14 = vadd.f32 %v2481_v16, %v2392_v31  ;;  %v2483_v18 = vpop.f32.mrb[39].mxu1 }
 0x3ae   :  { %v2520_v29 = vadd.f32 %v2517_v61, %v2482_v14 }
 0x3af   :  { %v2488_v63 = vpop.f32.mrb[40].mxu1  ;;  %v2559_v56 = vpop.permute.xlu1 %2558 }
 0x3b0   :  { %2523 = vst.msk [vmem:[#allocation4] sm:$0xff] %vm98_vm0, %v2520_v29  ;;  %v2489_v9 = vadd.f32 %v2488_v63, %v2399_v52  ;;  %v2490_v13 = vpop.f32.mrb[41].mxu1 }
 0x3b2   :  { %v2521_v3 = vadd.f32 %v2518_v1, %v2489_v9  ;;  %v3299_v1 = vsub.f32 %v5772_v24, %v3298_v46 }
 0x3b3   :  { %v2495_v39 = vpop.f32.mrb[42].mxu1  ;;  %v2569_v58 = vpop.permute.xlu1 %2568 }
 0x3b4   :  { %2524 = vst.msk [vmem:[#allocation4 + $0x8] sm:$0xff] %vm98_vm0, %v2521_v3  ;;  %v2496_v57 = vadd.f32 %v2495_v39, %v2406_v55  ;;  %v2497_v62 = vpop.f32.mrb[43].mxu1  ;;  %v3300_v13 = vand.u32 4294901760, %v3299_v1 }
 0x3b5   :  { %v2580_v62 = vpop.permute.xlu0 %2579 }
 0x3b6   :  { %v2522_v2 = vadd.f32 %v2519_v28, %v2496_v57  ;;  %v4252_v57 = vld [vmem:[%s5904_s6] ss:$0 sm:$0xff] }
 0x3b7   :  { %v2553_v15 = vld [vmem:[#allocation4] sm:$0xff] }
 0x3b8   :  { %v2571_v5 = vmul.f32 %v2559_v56, %v2553_v15  ;;  %2525 = vst.msk [vmem:[#allocation4 + $0x10] sm:$0xff] %vm98_vm0, %v2522_v2  ;;  %v2598_v2 = vmul.f32 %v4252_v57, %v2580_v62  ;;  %v2585_v15 = vpop.permute.xlu1 %2584 }
 0x3ba   :  { %v2602_v60 = vsel %vm98_vm0, %v2571_v5, 0  ;;  %v3155_v5 = vld [vmem:[#allocation11] sm:$0xff] }
 0x3bb   :  { %v2677_v27 = vand.u32 4294901760, %v2602_v60  ;;  %v2554_v20 = vld [vmem:[#allocation4 + $0x8] sm:$0xff] }
 0x3bc   :  { %v2572_v49 = vmul.f32 %v2564_v11, %v2554_v20 }
 0x3bd   :  { %v2678_v21 = vsub.f32 %v2602_v60, %v2677_v27 }
 0x3be   :  { %v2605_v22 = vsel %vm98_vm0, %v2572_v49, 0  ;;  %v2590_v49 = vpop.permute.xlu0 %2589 }
 0x3bf   :  { %v2679_v41 = vand.u32 4294901760, %v2678_v21  ;;  %v2687_v53 = vand.u32 4294901760, %v2605_v22  ;;  %v2555_v34 = vld [vmem:[#allocation4 + $0x10] sm:$0xff] }
 0x3c0   :  { %v2573_v44 = vmul.f32 %v2569_v58, %v2555_v34 }
 0x3c1   :  { %v2680_v17 = vsub.f32 %v2678_v21, %v2679_v41  ;;  %v2688_v43 = vsub.f32 %v2605_v22, %v2687_v53  ;;  %v3156_v22 = vld [vmem:[#allocation11 + $0x8] sm:$0xff] }
 0x3c2   :  { %v2608_v23 = vsel %vm98_vm0, %v2573_v44, 0  ;;  %vm3165_vm0 = vcmask 261120   ;;  %v2600_v44 = vmul.f32 %v4252_v57, %v2590_v49 }
 0x3c3   :  { %v2681_v25 = vand.u32 4294901760, %v2680_v17  ;;  %v2689_v36 = vand.u32 4294901760, %v2688_v43  ;;  %v2697_v59 = vand.u32 4294901760, %v2608_v23 }
 0x3c5   :  { %4355 = vmatmul.mubr.f32.vlgmr.msra.gmra.mrb[32].mxu0 %v2681_v25  ;;  %v2690_v6 = vsub.f32 %v2688_v43, %v2689_v36  ;;  %v2698_v8 = vsub.f32 %v2608_v23, %v2697_v59  ;;  %v3157_v25 = vld [vmem:[#allocation11 + $0x10] sm:$0xff] }
 0x3c6   :  { %4357 = vmatprep.mubr.msk.f32.mxu0 %vm5027_vm1, %v5023_v0  ;;  %4685 = vmatpush3.bf16.msra.mxu0 %v5688_v32  ;;  %v3179_v32 = vand.u32 4294901760, %v3162_v33 }
 0x3c7   :  { %v2691_v10 = vand.u32 4294901760, %v2690_v6  ;;  %v2699_v12 = vand.u32 4294901760, %v2698_v8  ;;  %4686 = vmatprep.subr.bf16.mxu0 %v5026_v4 }
 0x3c8   :  { %v5766_v26 = vsub.f32 %v3162_v33, %v3179_v32 }
 0x3c9   :  { %4358 = vmatmul.mubr.f32.gmra.mrb[34].mxu0 %v2691_v10  ;;  %v2700_v7 = vsub.f32 %v2698_v8, %v2699_v12 }
 0x3ca   :  { %4360 = vmatprep.mubr.msk.f32.mxu0 %vm5027_vm1, %v5023_v0  ;;  %v3284_v55 = vand.u32 4294901760, %v5766_v26 }
 0x3cb   :  { %v2701_v31 = vand.u32 4294901760, %v2700_v7 }
 0x3cc   :  { %v3285_v61 = vsub.f32 %v5766_v26, %v3284_v55 }
 0x3cd   :  { %4361 = vmatmul.mubr.f32.gmra.mrb[36].mxu0 %v2701_v31 }
 0x3ce   :  { %4367 = vmatprep.mubr.msk.f32.mxu0 %vm5027_vm1, %v5023_v0  ;;  %v3286_v18 = vand.u32 4294901760, %v3285_v61 }
 0x3d1   :  { %4368 = vmatmul.mubr.f32.vlgmr.msra.gmra.mrb[32].mxu0 %v2677_v27 }
 0x3d2   :  { %4370 = vmatprep.mubr.msk.f32.mxu0 %vm5027_vm1, %v5023_v0  ;;  %4688 = vmatpush3.bf16.msra.mxu0 %v4687_v45 }
 0x3d3   :  { %4689 = vmatprep.subr.bf16.mxu0 %v5026_v4 }
 0x3d5   :  { %4371 = vmatmul.mubr.f32.gmra.mrb[34].mxu0 %v2687_v53 }
 0x3d6   :  { %4373 = vmatprep.mubr.msk.f32.mxu0 %vm5027_vm1, %v5023_v0 }
 0x3d9   :  { %4374 = vmatmul.mubr.f32.gmra.mrb[36].mxu0 %v2697_v59 }
 0x3da   :  { %4380 = vmatprep.mubr.msk.f32.mxu0 %vm5027_vm1, %v5023_v0 }
 0x3dd   :  { %4381 = vmatmul.mubr.f32.vlgmr.msra.gmra.mrb[32].mxu0 %v2678_v21 }
 0x3de   :  { %4383 = vmatprep.mubr.msk.f32.mxu0 %vm5027_vm1, %v5023_v0  ;;  %4691 = vmatpush3.bf16.msra.mxu0 %v5673_v51 }
 0x3df   :  { %4692 = vmatprep.subr.bf16.mxu0 %v5026_v4 }
 0x3e1   :  { %4384 = vmatmul.mubr.f32.gmra.mrb[34].mxu0 %v2688_v43 }
 0x3e2   :  { %4386 = vmatprep.mubr.msk.f32.mxu0 %vm5027_vm1, %v5023_v0 }
 0x3e5   :  { %4387 = vmatmul.mubr.f32.gmra.mrb[36].mxu0 %v2698_v8 }
 0x3e6   :  { %4393 = vmatprep.mubr.msk.f32.mxu0 %vm5027_vm1, %v5023_v0 }
 0x3e9   :  { %4394 = vmatmul.mubr.f32.vlgmr.msra.gmra.mrb[32].mxu0 %v2679_v41 }
 0x3ea   :  { %4396 = vmatprep.mubr.msk.f32.mxu0 %vm5027_vm1, %v5023_v0  ;;  %4694 = vmatpush3.bf16.msra.mxu0 %v5692_v30  ;;  %v3163_v30 = vld [vmem:[%s5905_s7 + $0x10] sm:$0xff] }
 0x3eb   :  { %4695 = vmatprep.subr.bf16.mxu0 %v5026_v4  ;;  %v3182_v42 = vand.u32 4294901760, %v3163_v30 }
 0x3ed   :  { %4397 = vmatmul.mubr.f32.gmra.mrb[34].mxu0 %v2689_v36  ;;  %v5768_v35 = vpack.c.bf16 %v3185_v50, %v3182_v42  ;;  %v5770_v47 = vsub.f32 %v3163_v30, %v3182_v42 }
 0x3ee   :  { %4399 = vmatprep.mubr.msk.f32.mxu0 %vm5027_vm1, %v5023_v0 }
 0x3ef   :  { %v3291_v19 = vand.u32 4294901760, %v5770_v47  ;;  %v4714_v3 = vpack.c.bf16 %v5772_v24, %v5770_v47 }
 0x3f1   :  { %4400 = vmatmul.mubr.f32.gmra.mrb[36].mxu0 %v2699_v12  ;;  %v3292_v63 = vsub.f32 %v5770_v47, %v3291_v19  ;;  %v5790_v28 = vpack.c.bf16 %v3298_v46, %v3291_v19 }
 0x3f2   :  { %4406 = vmatprep.mubr.msk.f32.mxu0 %vm5027_vm1, %v5023_v0 }
 0x3f3   :  { %v3293_v9 = vand.u32 4294901760, %v3292_v63 }
 0x3f5   :  { %4407 = vmatmul.mubr.f32.vlgmr.msra.gmra.mrb[32].mxu0 %v2677_v27  ;;  %v4708_v54 = vpack.c.bf16 %v3300_v13, %v3293_v9 }
 0x3f6   :  { %4409 = vmatprep.mubr.msk.f32.mxu0 %vm5027_vm1, %v5023_v0  ;;  %4697 = vmatpush3.bf16.msra.mxu0 %v5673_v51  ;;  %v3161_v51 = vld [vmem:[%s5905_s7] sm:$0xff] }
 0x3f7   :  { %4737 = vmatprep.subr.bf16.mxu0 %v5026_v4  ;;  %v3176_v48 = vand.u32 4294901760, %v3161_v51 }
 0x3f9   :  { %4410 = vmatmul.mubr.f32.gmra.mrb[34].mxu0 %v2687_v53  ;;  %v5754_v45 = vpack.c.bf16 %v3179_v32, %v3176_v48  ;;  %v5764_v52 = vsub.f32 %v3161_v51, %v3176_v48 }
 0x3fa   :  { %4412 = vmatprep.mubr.msk.f32.mxu0 %vm5027_vm1, %v5023_v0 }
 0x3fb   :  { %4700 = vmatpush3.bf16.msra.mxu1 %v5754_v45  ;;  %v3277_v38 = vand.u32 4294901760, %v5764_v52  ;;  %v4711_v37 = vpack.c.bf16 %v5766_v26, %v5764_v52 }
 0x3fc   :  { %4701 = vmatprep.subr.bf16.mxu1 %v5026_v4 }
 0x3fd   :  { %4413 = vmatmul.mubr.f32.gmra.mrb[36].mxu0 %v2697_v59  ;;  %v3278_v16 = vsub.f32 %v5764_v52, %v3277_v38  ;;  %v5788_v39 = vpack.c.bf16 %v3284_v55, %v3277_v38 }
 0x3fe   :  { %4419 = vmatprep.mubr.msk.f32.mxu0 %vm5027_vm1, %v5023_v0 }
 0x3ff   :  { %4703 = vmatpush3.bf16.msra.mxu1 %v5768_v35  ;;  %v3279_v14 = vand.u32 4294901760, %v3278_v16 }
 0x400   :  { %4704 = vmatprep.subr.bf16.mxu1 %v5026_v4 }
 0x401   :  { %4420 = vmatmul.mubr.f32.vlgmr.msra.gmra.mrb[32].mxu0 %v2677_v27  ;;  %v4705_v29 = vpack.c.bf16 %v3286_v18, %v3279_v14  ;;  %v2599_v27 = vmul.f32 %v4252_v57, %v2585_v15 }
 0x402   :  { %4422 = vmatprep.mubr.msk.f32.mxu0 %vm5027_vm1, %v5023_v0 }
 0x405   :  { %4423 = vmatmul.mubr.f32.gmra.mrb[34].mxu0 %v2687_v53 }
 0x406   :  { %4425 = vmatprep.mubr.msk.f32.mxu0 %vm5027_vm1, %v5023_v0 }
 0x409   :  { %4426 = vmatmul.mubr.f32.gmra.mrb[36].mxu0 %v2697_v59 }
 0x40a   :  { %4545 = vmatprep.mubr.msk.f32.mxu0 %vm5027_vm1, %v5023_v0 }
 0x4d4   :  { %v3139_v56 = vpop.f32.mrb[32].mxu0 }
 0x4d5   :  { %v4752_v60 = vadd.f32 %v3139_v56, %v2598_v2  ;;  %v4421_v11 = vpop.f32.mrb[33].mxu0 }
 0x4d7   :  { %v3158_v20 = vmul.f32 %v4752_v60, %v3155_v5 }
 0x4d8   :  { %v3145_v21 = vpop.f32.mrb[34].mxu0 }
 0x4d9   :  { %v3167_v41 = vsel %vm3165_vm0, %v3158_v20, 0  ;;  %v4753_v58 = vadd.f32 %v3145_v21, %v2599_v27  ;;  %v4424_v53 = vpop.f32.mrb[35].mxu0 }
 0x4da   :  { %v5796_v34 = vand.u32 4294901760, %v3167_v41 }
 0x4db   :  { %v3159_v17 = vmul.f32 %v4753_v58, %v3156_v22  ;;  %v4253_v22 = vld [vmem:[%s5907_s9] ss:$0 sm:$0xff] }
 0x4dc   :  { %v3245_v43 = vsub.f32 %v3167_v41, %v5796_v34  ;;  %v3151_v23 = vpop.f32.mrb[36].mxu0 }
 0x4dd   :  { %v3170_v36 = vsel %vm3165_vm0, %v3159_v17, 0  ;;  %v4754_v59 = vadd.f32 %v3151_v23, %v2600_v44  ;;  %v4427_v6 = vpop.f32.mrb[37].mxu0 }
 0x4de   :  { %v3246_v8 = vand.u32 4294901760, %v3245_v43  ;;  %v5800_v10 = vand.u32 4294901760, %v3170_v36 }
 0x4df   :  { %v3160_v12 = vmul.f32 %v4754_v59, %v3157_v25 }
 0x4e0   :  { %v3247_v7 = vsub.f32 %v3245_v43, %v3246_v8  ;;  %v3255_v31 = vsub.f32 %v3170_v36, %v5800_v10 }
 0x4e1   :  { %v3173_v51 = vsel %vm3165_vm0, %v3160_v12, 0 }
 0x4e2   :  { %v3248_v33 = vand.u32 4294901760, %v3247_v7  ;;  %v3264_v48 = vand.u32 4294901760, %v3173_v51  ;;  %v3256_v32 = vand.u32 4294901760, %v3255_v31 }
 0x4e4   :  { %v3265_v30 = vsub.f32 %v3173_v51, %v3264_v48  ;;  %4437 = vmatmul.mubr.f32.vlgmr.msra.gmra.mrb[44].mxu1 %v3248_v33  ;;  %v3257_v40 = vsub.f32 %v3255_v31, %v3256_v32 }
 0x4e5   :  { %4439 = vmatprep.mubr.msk.f32.mxu1 %vm5027_vm1, %v5023_v0  ;;  %4706 = vmatpush3.bf16.msra.mxu1 %v4705_v29 }
 0x4e6   :  { %v3258_v42 = vand.u32 4294901760, %v3257_v40  ;;  %v3266_v50 = vand.u32 4294901760, %v3265_v30  ;;  %4707 = vmatprep.subr.bf16.mxu1 %v5026_v4 }
 0x4e8   :  { %4440 = vmatmul.mubr.f32.gmra.mrb[46].mxu1 %v3258_v42  ;;  %v3267_v52 = vsub.f32 %v3265_v30, %v3266_v50 }
 0x4e9   :  { %4442 = vmatprep.mubr.msk.f32.mxu1 %vm5027_vm1, %v5023_v0  ;;  %4709 = vmatpush3.bf16.msra.mxu1 %v4708_v54 }
 0x4ea   :  { %v3268_v26 = vand.u32 4294901760, %v3267_v52  ;;  %4710 = vmatprep.subr.bf16.mxu1 %v5026_v4 }
 0x4ec   :  { %4443 = vmatmul.mubr.f32.gmra.mrb[48].mxu1 %v3268_v26 }
 0x4ed   :  { %4453 = vmatprep.mubr.msk.f32.mxu1 %vm5027_vm1, %v5023_v0 }
 0x4f0   :  { %4454 = vmatmul.mubr.f32.vlgmr.msra.gmra.mrb[44].mxu1 %v5796_v34 }
 0x4f1   :  { %4456 = vmatprep.mubr.msk.f32.mxu1 %vm5027_vm1, %v5023_v0  ;;  %4712 = vmatpush3.bf16.msra.mxu1 %v4711_v37 }
 0x4f2   :  { %4713 = vmatprep.subr.bf16.mxu1 %v5026_v4 }
 0x4f4   :  { %4457 = vmatmul.mubr.f32.gmra.mrb[46].mxu1 %v5800_v10 }
 0x4f5   :  { %4459 = vmatprep.mubr.msk.f32.mxu1 %vm5027_vm1, %v5023_v0  ;;  %4715 = vmatpush3.bf16.msra.mxu1 %v4714_v3 }
 0x4f6   :  { %4716 = vmatprep.subr.bf16.mxu1 %v5026_v4 }
 0x4f8   :  { %4460 = vmatmul.mubr.f32.gmra.mrb[48].mxu1 %v3264_v48 }
 0x4f9   :  { %4470 = vmatprep.mubr.msk.f32.mxu1 %vm5027_vm1, %v5023_v0 }
 0x4fc   :  { %4471 = vmatmul.mubr.f32.vlgmr.msra.gmra.mrb[44].mxu1 %v3245_v43 }
 0x4fd   :  { %4473 = vmatprep.mubr.msk.f32.mxu1 %vm5027_vm1, %v5023_v0  ;;  %4718 = vmatpush3.bf16.msra.mxu1 %v5754_v45 }
 0x4fe   :  { %4719 = vmatprep.subr.bf16.mxu1 %v5026_v4 }
 0x500   :  { %4474 = vmatmul.mubr.f32.gmra.mrb[46].mxu1 %v3255_v31 }
 0x501   :  { %4476 = vmatprep.mubr.msk.f32.mxu1 %vm5027_vm1, %v5023_v0  ;;  %4721 = vmatpush3.bf16.msra.mxu1 %v5768_v35 }
 0x502   :  { %4722 = vmatprep.subr.bf16.mxu1 %v5026_v4 }
 0x504   :  { %4477 = vmatmul.mubr.f32.gmra.mrb[48].mxu1 %v3265_v30 }
 0x505   :  { %4487 = vmatprep.mubr.msk.f32.mxu1 %vm5027_vm1, %v5023_v0 }
 0x508   :  { %4488 = vmatmul.mubr.f32.vlgmr.msra.gmra.mrb[44].mxu1 %v3246_v8 }
 0x509   :  { %4490 = vmatprep.mubr.msk.f32.mxu1 %vm5027_vm1, %v5023_v0  ;;  %4724 = vmatpush3.bf16.msra.mxu1 %v5788_v39 }
 0x50a   :  { %4725 = vmatprep.subr.bf16.mxu1 %v5026_v4 }
 0x50c   :  { %4491 = vmatmul.mubr.f32.gmra.mrb[46].mxu1 %v3256_v32 }
 0x50d   :  { %4493 = vmatprep.mubr.msk.f32.mxu1 %vm5027_vm1, %v5023_v0  ;;  %4727 = vmatpush3.bf16.msra.mxu1 %v5790_v28 }
 0x50e   :  { %4728 = vmatprep.subr.bf16.mxu1 %v5026_v4 }
 0x510   :  { %4494 = vmatmul.mubr.f32.gmra.mrb[48].mxu1 %v3266_v50 }
 0x511   :  { %4504 = vmatprep.mubr.msk.f32.mxu1 %vm5027_vm1, %v5023_v0 }
 0x514   :  { %4505 = vmatmul.mubr.f32.vlgmr.msra.gmra.mrb[44].mxu1 %v5796_v34 }
 0x515   :  { %4507 = vmatprep.mubr.msk.f32.mxu1 %vm5027_vm1, %v5023_v0  ;;  %4730 = vmatpush3.bf16.msra.mxu1 %v5754_v45  ;;  %v3746_v45 = vld [vmem:[%s5906_s8] sm:$0x7] }
 0x516   :  { %4731 = vmatprep.subr.bf16.mxu1 %v5026_v4 }
 0x518   :  { %4508 = vmatmul.mubr.f32.gmra.mrb[46].mxu1 %v5800_v10 }
 0x519   :  { %4510 = vmatprep.mubr.msk.f32.mxu1 %vm5027_vm1, %v5023_v0  ;;  %4733 = vmatpush3.bf16.msra.mxu1 %v5768_v35  ;;  %v3756_v35 = vsel %vm3754_vm3, %v3746_v45, 0 }
 0x51a   :  { %4734 = vmatprep.subr.bf16.mxu1 %v5026_v4  ;;  %v3826_v24 = vand.u32 4294901760, %v3756_v35 }
 0x51c   :  { %4511 = vmatmul.mubr.f32.gmra.mrb[48].mxu1 %v3264_v48  ;;  %v3827_v16 = vsub.f32 %v3756_v35, %v3826_v24 }
 0x51d   :  { %4521 = vmatprep.mubr.msk.f32.mxu1 %vm5027_vm1, %v5023_v0 }
 0x51e   :  { %v3828_v18 = vand.u32 4294901760, %v3827_v16 }
 0x520   :  { %4522 = vmatmul.mubr.f32.vlgmr.msra.gmra.mrb[44].mxu1 %v5796_v34  ;;  %v3829_v63 = vsub.f32 %v3827_v16, %v3828_v18 }
 0x521   :  { %4524 = vmatprep.mubr.msk.f32.mxu1 %vm5027_vm1, %v5023_v0 }
 0x522   :  { %v3830_v57 = vand.u32 4294901760, %v3829_v63 }
 0x524   :  { %4525 = vmatmul.mubr.f32.gmra.mrb[46].mxu1 %v5800_v10 }
 0x525   :  { %4527 = vmatprep.mubr.msk.f32.mxu1 %vm5027_vm1, %v5023_v0 }
 0x528   :  { %4528 = vmatmul.mubr.f32.gmra.mrb[48].mxu1 %v3264_v48 }
 0x529   :  { %4536 = vmatprep.mubr.msk.f32.mxu1 %vm5027_vm1, %v5023_v0 }
 0x5f3   :  { %v3730_v47 = vpop.f32.mrb[44].mxu1 }
 0x5f4   :  { %v3759_v38 = vand.u32 4294901760, %v3730_v47  ;;  %v4523_v55 = vpop.f32.mrb[45].mxu1 }
 0x5f6   :  { %v3838_v61 = vsub.f32 %v3730_v47, %v3759_v38 }
 0x5f7   :  { %v3736_v14 = vpop.f32.mrb[46].mxu1 }
 0x5f8   :  { %v3839_v19 = vand.u32 4294901760, %v3838_v61  ;;  %v3762_v46 = vand.u32 4294901760, %v3736_v14  ;;  %v4526_v29 = vpop.f32.mrb[47].mxu1 }
 0x5fa   :  { %v4735_v1 = vpack.c.bf16 %v3762_v46, %v3759_v38  ;;  %v3845_v9 = vsub.f32 %v3736_v14, %v3762_v46  ;;  %v3840_v54 = vsub.f32 %v3838_v61, %v3839_v19 }
 0x5fb   :  { %v3742_v13 = vpop.f32.mrb[48].mxu1 }
 0x5fc   :  { %v3846_v37 = vand.u32 4294901760, %v3845_v9  ;;  %v4741_v3 = vpack.c.bf16 %v3845_v9, %v3838_v61  ;;  %v3765_v39 = vand.u32 4294901760, %v3742_v13  ;;  %v4529_v28 = vpop.f32.mrb[49].mxu1  ;;  %4736 = vmatpush3.bf16.msra.mxu1 %v4735_v1  ;;  %v3841_v56 = vand.u32 4294901760, %v3840_v54 }
 0x5fd   :  { %4534 = vmatprep.subr.mxu1 %v5023_v0 }
 0x5fe   :  { %v3847_v62 = vsub.f32 %v3845_v9, %v3846_v37  ;;  %v3852_v2 = vsub.f32 %v3742_v13, %v3765_v39  ;;  %v4747_v15 = vpack.c.bf16 %v3846_v37, %v3839_v19 }
 0x600   :  { %v3848_v5 = vand.u32 4294901760, %v3847_v62  ;;  %v3853_v60 = vand.u32 4294901760, %v3852_v2  ;;  %4535 = vmatpush3.msra.mxu1 %v3765_v39 }
 0x601   :  { %4537 = vmatmul.mubr.f32.vlgmr.msra.gmra.mrb[50].mxu1 %v3830_v57 }
 0x602   :  { %v3854_v11 = vsub.f32 %v3852_v2, %v3853_v60  ;;  %v4738_v27 = vpack.c.bf16 %v3848_v5, %v3841_v56 }
 0x604   :  { %4739 = vmatpush3.bf16.msra.mxu0 %v4738_v27  ;;  %v3855_v20 = vand.u32 4294901760, %v3854_v11 }
 0x605   :  { %4543 = vmatprep.subr.mxu0 %v5023_v0 }
 0x608   :  { %4544 = vmatpush3.msra.mxu0 %v3855_v20 }
 0x609   :  { %4546 = vmatmul.mubr.f32.vlgmr.msra.gmra.mrb[38].mxu0 %v3826_v24  ;;  %4740 = vmatprep.subr.bf16.mxu0 %v5026_v4 }
 0x60a   :  { %4742 = vmatpush3.bf16.msra.mxu0 %v4741_v3  ;;  %4554 = vmatprep.mubr.msk.f32.mxu0 %vm5027_vm1, %v5023_v0 }
 0x60b   :  { %4552 = vmatprep.subr.mxu0 %v5023_v0 }
 0x60e   :  { %4553 = vmatpush3.msra.mxu0 %v3852_v2 }
 0x60f   :  { %4743 = vmatprep.subr.bf16.mxu0 %v5026_v4 }
 0x611   :  { %4555 = vmatmul.mubr.f32.vlgmr.msra.gmra.mrb[38].mxu0 %v3827_v16 }
 0x612   :  { %4745 = vmatpush3.bf16.msra.mxu0 %v4735_v1  ;;  %4563 = vmatprep.mubr.msk.f32.mxu0 %vm5027_vm1, %v5023_v0 }
 0x613   :  { %4561 = vmatprep.subr.mxu0 %v5023_v0 }
 0x616   :  { %4562 = vmatpush3.msra.mxu0 %v3765_v39 }
 0x617   :  { %4746 = vmatprep.subr.bf16.mxu0 %v5026_v4 }
 0x619   :  { %4564 = vmatmul.mubr.f32.vlgmr.msra.gmra.mrb[38].mxu0 %v3828_v18 }
 0x61a   :  { %4748 = vmatpush3.bf16.msra.mxu0 %v4747_v15  ;;  %4572 = vmatprep.mubr.msk.f32.mxu0 %vm5027_vm1, %v5023_v0 }
 0x61b   :  { %4570 = vmatprep.subr.mxu0 %v5023_v0 }
 0x61e   :  { %4571 = vmatpush3.msra.mxu0 %v3853_v60 }
 0x61f   :  { %4749 = vmatprep.subr.bf16.mxu0 %v5026_v4 }
 0x621   :  { %4573 = vmatmul.mubr.f32.vlgmr.msra.gmra.mrb[38].mxu0 %v3826_v24 }
 0x622   :  { %4751 = vmatpush3.bf16.msra.mxu0 %v4735_v1  ;;  %4581 = vmatprep.mubr.msk.f32.mxu0 %vm5027_vm1, %v5023_v0 }
 0x623   :  { %4579 = vmatprep.subr.mxu0 %v5023_v0 }
 0x626   :  { %4580 = vmatpush3.msra.mxu0 %v3765_v39 }
 0x629   :  { %4582 = vmatmul.mubr.f32.vlgmr.msra.gmra.mrb[38].mxu0 %v3826_v24 }
 0x6d4   :  { %v3832_v49 = vpop.f32.mrb[50].mxu1 }
 0x6d5   :  { %v4538_v21 = vpop.f32.mrb[51].mxu1  ;;  %v3833_v41 = vadd.f32 %v4253_v22, %v3832_v49 }
 0x6fc   :  { %v4226_v58 = vpop.f32.mrb[38].mxu0 }
 0x6fd   :  { %v4756_v4 = vadd.f32 %v4226_v58, %v3833_v41  ;;  %v4583_v53 = vpop.f32.mrb[39].mxu0 }
 0x6ff   :  { %4231 = vst.msk [vmem:[#allocation13] sm:$0x7] %vm4230_vm4, %v4756_v4 }
 0x700   :  { %4996 = shalt.err (!%p4993_p8)
}
 0x701   :  { %s4997_s9 = scalar_lea.hbm %s5908_s10, 64 }
 0x702   :  { %p4998_p9 = scmp.ne.s32.totalorder %s5908_s10, %s4997_s9  ;;  %p5001_p10 = scmp.lt.u32.totalorder %s4997_s9, %s5908_s10 }
 0x704   :  { %p5003_p11 = pnand %p5001_p10, %p4998_p9 }
 0x706   :  { %5006 = shalt.err (!%p5003_p11)
}
 0x707   :  { %4241 = dma.vmem_to_hbm [thread:$0]  %s4239_s2, 64, %s5908_s10, [#allocation7]  }
 0x708   :  { %5013 = dma.done.wait [#allocation7], 64  }
 0x709   :  { %5014 = vsyncadd [#allocation7], 4294967232 }
 0x70a   :  { %4245 = vsyncpa [#allocation6], 1 }
 0x70b   :  { %4246 = vsyncpa [#allocation9], 1 }
 0x70c   :  { %4247 = vsyncpa [#allocation12], 1 }
 0x70d   :  { %4248 = vsyncpa [#allocation7], 1 }

</bundles_post_ra>
